<compile_context>
chip_gen: v7x
topology: tpu7x:2x2x1
jax: 0.10.0
libtpu: 0.0.40
codegen_flags: <defaults>
</compile_context>

<pallas_src>
import functools

import jax
import jax.numpy as jnp
from jax.experimental import pallas as pl
from jax.experimental.pallas import tpu as pltpu


def _projection_kernel(
    x_ref,             # (bm2, 2*x_dim)          packed pair of batch rows
    w1f_ref, b1_ref,   # (2*x_dim, 2*(h1+F)),    (1, 2*h1)
    w2_ref,  b2_ref,   # (2*h1, 2*h2),           (1, 2*h2)
    w3_ref,  b3_ref,   # (2*h2, 2*L),            (1, 2*L)
    out_ref,           # (bm2, 2*(L+F))          lane-dense fused output
    *, h1, L, F,
):
    x = x_ref[...]

    # One MXU pass shared by both branches and both rows of the pair.
    # Column layout (by construction in prepare_params):
    #   [ h1_even | h1_odd | F_even | F_odd ]
    xw = jnp.dot(x, w1f_ref[...], preferred_element_type=jnp.float32)

    # ---- learned branch: Linear -> ReLU -> Linear -> ReLU -> Linear --------
    h = jnp.maximum(xw[:, : 2 * h1] + b1_ref[...], 0.0)
    h = jnp.maximum(
        jnp.dot(h, w2_ref[...], preferred_element_type=jnp.float32) + b2_ref[...],
        0.0,
    )
    learned = (
        jnp.dot(h, w3_ref[...], preferred_element_type=jnp.float32) + b3_ref[...]
    )  # (bm2, 2*L) = [ L_even | L_odd ]

    # ---- fixed branch: StochasticFeatures('trig') -> sin(x @ W_fixed) ------
    fixed = jnp.sin(xw[:, 2 * h1:])  # (bm2, 2*F) = [ F_even | F_odd ]

    # Interleave into the packed output row [L_e, F_e, L_o, F_o], which is the
    # row-major view of torch.cat([learned, fixed], -1) for rows 2j, 2j+1.
    out_ref[...] = jnp.concatenate(
        [learned[:, :L], fixed[:, :F], learned[:, L:], fixed[:, F:]], axis=-1
    ).astype(out_ref.dtype)


def prepare_params(params):
    """One-time packing of (in, out)-layout weights into 2x block-diagonal
    form used by the kernel (hoisted out of the per-forward path)."""
    w1, b1 = params["w1"], params["b1"]
    w2, b2 = params["w2"], params["b2"]
    w3, b3 = params["w3"], params["b3"]
    wfix = params["w_fixed"]

    x_dim, h1 = w1.shape
    h2 = w2.shape[1]
    L = w3.shape[1]
    F = wfix.shape[1]

    # Fused layer-1 + fixed-basis weight, columns ordered [h1_e|h1_o|F_e|F_o].
    w1f = jnp.zeros((2 * x_dim, 2 * (h1 + F)), jnp.float32)
    w1f = w1f.at[:x_dim, :h1].set(w1)
    w1f = w1f.at[x_dim:, h1:2 * h1].set(w1)
    w1f = w1f.at[:x_dim, 2 * h1:2 * h1 + F].set(wfix)
    w1f = w1f.at[x_dim:, 2 * h1 + F:].set(wfix)

    def blkdiag2(w):
        a, b = w.shape
        z = jnp.zeros((2 * a, 2 * b), w.dtype)
        z = z.at[:a, :b].set(w)
        z = z.at[a:, b:].set(w)
        return z

    return {
        "w1f": w1f,
        "b1": jnp.concatenate([b1, b1]).reshape(1, 2 * h1),
        "w2": blkdiag2(w2),
        "b2": jnp.concatenate([b2, b2]).reshape(1, 2 * h2),
        "w3": blkdiag2(w3),
        "b3": jnp.concatenate([b3, b3]).reshape(1, 2 * L),
    }


@functools.partial(jax.jit, static_argnames=("block_rows",))
def projection_nets_forward(x, prepped, *, block_rows=2048):
    """x: (N, x_dim) float32. prepped: output of prepare_params.
    Returns (N, num_learned_basis + num_fixed_basis).
    block_rows = packed rows per grid step (= 2x batch rows)."""
    w1f, b1 = prepped["w1f"], prepped["b1"]
    w2, b2 = prepped["w2"], prepped["b2"]
    w3, b3 = prepped["w3"], prepped["b3"]

    N, x_dim = x.shape
    assert w1f.shape[0] == 2 * x_dim
    h1 = b1.shape[1] // 2
    F = w1f.shape[1] // 2 - h1
    L = b3.shape[1] // 2
    out_w = 2 * (L + F)

    # Pack two batch rows per view row (free row-major view); odd N pads 1 row.
    Np = N + (N % 2)
    if Np != N:
        x = jnp.pad(x, ((0, 1), (0, 0)))
    Np2 = Np // 2
    x2 = x.reshape(Np2, 2 * x_dim)

    # Batch tile: single full block if it fits, else sublane-aligned tile with
    # a masked partial last block (no full-batch padding / output slicing).
    if Np2 <= block_rows:
        bm2 = Np2
    else:
        bm2 = max(8, (block_rows // 8) * 8)
    grid = pl.cdiv(Np2, bm2)

    full = lambda shape: pl.BlockSpec(shape, lambda i: (0, 0))

    out2 = pl.pallas_call(
        functools.partial(_projection_kernel, h1=h1, L=L, F=F),
        out_shape=jax.ShapeDtypeStruct((Np2, out_w), x.dtype),
        grid_spec=pltpu.PrefetchScalarGridSpec(
            num_scalar_prefetch=0,
            grid=(grid,),
            in_specs=[
                pl.BlockSpec((bm2, 2 * x_dim), lambda i: (i, 0)),
                full(w1f.shape), full(b1.shape),
                full(w2.shape), full(b2.shape),
                full(w3.shape), full(b3.shape),
            ],
            out_specs=pl.BlockSpec((bm2, out_w), lambda i: (i, 0)),
        ),
        compiler_params=pltpu.CompilerParams(
            dimension_semantics=("parallel",),
            vmem_limit_bytes=48 * 1024 * 1024,
        ),
    )(x2, w1f, b1, w2, b2, w3, b3)

    out = out2.reshape(Np, L + F)   # free row-major view back to per-row layout
    if Np != N:
        out = out[:N]
    return out


def init_params(key, x_dim, hidden_dims, num_learned_basis, num_fixed_basis):
    """Deterministic parameter init. Weights stored as (in, out) = W^T
    (mirrors PyTorch nn.Linear's y = x @ W^T + b)."""
    layers = [x_dim] + list(hidden_dims) + [num_learned_basis]
    params = {}
    keys = jax.random.split(key, 2 * (len(layers) - 1) + 1)
    for i in range(len(layers) - 1):
        fan_in, fan_out = layers[i], layers[i + 1]
        bound = 1.0 / jnp.sqrt(fan_in)
        params[f"w{i + 1}"] = jax.random.uniform(
            keys[2 * i], (fan_in, fan_out), jnp.float32, -bound, bound)
        params[f"b{i + 1}"] = jax.random.uniform(
            keys[2 * i + 1], (fan_out,), jnp.float32, -bound, bound)
    # StochasticFeatures prior = torch.nn.init.normal_ (mean 0, std 1), frozen.
    params["w_fixed"] = jax.random.normal(
        keys[-1], (x_dim, num_fixed_basis), jnp.float32)
    return params


def reference_forward(x, params):
    h = jnp.maximum(x @ params["w1"] + params["b1"], 0.0)
    h = jnp.maximum(h @ params["w2"] + params["b2"], 0.0)
    learned = h @ params["w3"] + params["b3"]
    fixed = jnp.sin(x @ params["w_fixed"])
    return jnp.concatenate([learned, fixed], axis=-1)


if __name__ == "__main__":
    # Small shapes consistent with the module: x of shape (..., x_dim).
    x_dim = 16
    hidden_dims = [32, 32]
    num_learned_basis = 32
    num_fixed_basis = 32
    batch = 128

    key = jax.random.PRNGKey(0)
    kp, kx = jax.random.split(key)
    params = init_params(kp, x_dim, hidden_dims, num_learned_basis, num_fixed_basis)
    prepped = prepare_params(params)
    x = jax.random.normal(kx, (batch, x_dim), jnp.float32)

    out = jax.block_until_ready(projection_nets_forward(x, prepped))
    ref = reference_forward(x, params)
    assert out.shape == (batch, num_learned_basis + num_fixed_basis), out.shape
    assert jnp.allclose(out, ref, atol=1e-5, rtol=1e-5), "mismatch vs reference"

    # Ragged (not a tile multiple) and odd batch sizes exercise the masked
    # last block and the single-row pad path.
    for n in (100, 37):
        xr = jax.random.normal(kx, (n, x_dim), jnp.float32)
        o = jax.block_until_ready(projection_nets_forward(xr, prepped))
        r = reference_forward(xr, params)
        assert o.shape == r.shape, (o.shape, r.shape)
        assert jnp.allclose(o, r, atol=1e-5, rtol=1e-5), f"ragged mismatch n={n}"

    print("KERNEL_OK")
</pallas_src>

<mosaic_0001>
module attributes {stable_mosaic.version = 11 : i64} {
  func.func @_projection_kernel(%arg0: i32, %arg1: memref<64x32xf32, #tpu.memory_space<vmem>>, %arg2: memref<32x128xf32, #tpu.memory_space<vmem>>, %arg3: memref<1x64xf32, #tpu.memory_space<vmem>>, %arg4: memref<64x64xf32, #tpu.memory_space<vmem>>, %arg5: memref<1x64xf32, #tpu.memory_space<vmem>>, %arg6: memref<64x64xf32, #tpu.memory_space<vmem>>, %arg7: memref<1x64xf32, #tpu.memory_space<vmem>>, %arg8: memref<64x128xf32, #tpu.memory_space<vmem>>) attributes {dimension_semantics = [#tpu.dimension_semantics<parallel>], iteration_bounds = array<i64: 1>, scalar_prefetch = 0 : i64, scratch_operands = 0 : i64, tpu.core_type = #tpu.core_type<tc>, window_params = [{transform_indices = @transform_0, window_bounds = array<i64: 64, 32>}, {pipeline_mode = #tpu.pipeline_mode<synchronous>, transform_indices = @transform_1, window_bounds = array<i64: 32, 128>}, {pipeline_mode = #tpu.pipeline_mode<synchronous>, transform_indices = @transform_2, window_bounds = array<i64: 1, 64>}, {pipeline_mode = #tpu.pipeline_mode<synchronous>, transform_indices = @transform_3, window_bounds = array<i64: 64, 64>}, {pipeline_mode = #tpu.pipeline_mode<synchronous>, transform_indices = @transform_4, window_bounds = array<i64: 1, 64>}, {pipeline_mode = #tpu.pipeline_mode<synchronous>, transform_indices = @transform_5, window_bounds = array<i64: 64, 64>}, {pipeline_mode = #tpu.pipeline_mode<synchronous>, transform_indices = @transform_6, window_bounds = array<i64: 1, 64>}, {transform_indices = @transform_7, window_bounds = array<i64: 64, 128>}]} {
    %c0 = arith.constant 0 : index
    %c0_0 = arith.constant 0 : index
    %0 = vector.load %arg1[%c0, %c0_0] : memref<64x32xf32, #tpu.memory_space<vmem>>, vector<64x32xf32>
    %c0_1 = arith.constant 0 : index
    %c0_2 = arith.constant 0 : index
    %1 = vector.load %arg2[%c0_1, %c0_2] : memref<32x128xf32, #tpu.memory_space<vmem>>, vector<32x128xf32>
    %cst = arith.constant dense<0.000000e+00> : vector<64x128xf32>
    %2 = tpu.matmul %0, %1, %cst {dimension_numbers = #tpu.dot_dimension_numbers<[1], [0], [0], [1], [0, 0, 1, 1], [], []>} : vector<64x32xf32>, vector<32x128xf32>, vector<64x128xf32> -> vector<64x128xf32>
    %3 = vector.extract_strided_slice %2 {offsets = [0, 0], sizes = [64, 64], strides = [1, 1]} : vector<64x128xf32> to vector<64x64xf32>
    %c0_3 = arith.constant 0 : index
    %c0_4 = arith.constant 0 : index
    %4 = vector.load %arg3[%c0_3, %c0_4] : memref<1x64xf32, #tpu.memory_space<vmem>>, vector<1x64xf32>
    %5 = vector.broadcast %4 : vector<1x64xf32> to vector<64x64xf32>
    %6 = arith.addf %3, %5 : vector<64x64xf32>
    %cst_5 = arith.constant 0.000000e+00 : f32
    %7 = vector.broadcast %cst_5 : f32 to vector<64x64xf32>
    %8 = arith.maximumf %6, %7 : vector<64x64xf32>
    %c0_6 = arith.constant 0 : index
    %c0_7 = arith.constant 0 : index
    %9 = vector.load %arg4[%c0_6, %c0_7] : memref<64x64xf32, #tpu.memory_space<vmem>>, vector<64x64xf32>
    %cst_8 = arith.constant dense<0.000000e+00> : vector<64x64xf32>
    %10 = tpu.matmul %8, %9, %cst_8 {dimension_numbers = #tpu.dot_dimension_numbers<[1], [0], [0], [1], [0, 0, 1, 1], [], []>} : vector<64x64xf32>, vector<64x64xf32>, vector<64x64xf32> -> vector<64x64xf32>
    %c0_9 = arith.constant 0 : index
    %c0_10 = arith.constant 0 : index
    %11 = vector.load %arg5[%c0_9, %c0_10] : memref<1x64xf32, #tpu.memory_space<vmem>>, vector<1x64xf32>
    %12 = vector.broadcast %11 : vector<1x64xf32> to vector<64x64xf32>
    %13 = arith.addf %10, %12 : vector<64x64xf32>
    %cst_11 = arith.constant 0.000000e+00 : f32
    %14 = vector.broadcast %cst_11 : f32 to vector<64x64xf32>
    %15 = arith.maximumf %13, %14 : vector<64x64xf32>
    %c0_12 = arith.constant 0 : index
    %c0_13 = arith.constant 0 : index
    %16 = vector.load %arg6[%c0_12, %c0_13] : memref<64x64xf32, #tpu.memory_space<vmem>>, vector<64x64xf32>
    %cst_14 = arith.constant dense<0.000000e+00> : vector<64x64xf32>
    %17 = tpu.matmul %15, %16, %cst_14 {dimension_numbers = #tpu.dot_dimension_numbers<[1], [0], [0], [1], [0, 0, 1, 1], [], []>} : vector<64x64xf32>, vector<64x64xf32>, vector<64x64xf32> -> vector<64x64xf32>
    %c0_15 = arith.constant 0 : index
    %c0_16 = arith.constant 0 : index
    %18 = vector.load %arg7[%c0_15, %c0_16] : memref<1x64xf32, #tpu.memory_space<vmem>>, vector<1x64xf32>
    %19 = vector.broadcast %18 : vector<1x64xf32> to vector<64x64xf32>
    %20 = arith.addf %17, %19 : vector<64x64xf32>
    %21 = vector.extract_strided_slice %2 {offsets = [0, 64], sizes = [64, 64], strides = [1, 1]} : vector<64x128xf32> to vector<64x64xf32>
    %22 = math.sin %21 : vector<64x64xf32>
    %23 = vector.extract_strided_slice %20 {offsets = [0, 0], sizes = [64, 32], strides = [1, 1]} : vector<64x64xf32> to vector<64x32xf32>
    %24 = vector.extract_strided_slice %22 {offsets = [0, 0], sizes = [64, 32], strides = [1, 1]} : vector<64x64xf32> to vector<64x32xf32>
    %25 = vector.extract_strided_slice %20 {offsets = [0, 32], sizes = [64, 32], strides = [1, 1]} : vector<64x64xf32> to vector<64x32xf32>
    %26 = vector.extract_strided_slice %22 {offsets = [0, 32], sizes = [64, 32], strides = [1, 1]} : vector<64x64xf32> to vector<64x32xf32>
    %27 = tpu.concatenate %23, %24, %25, %26 in 1 : vector<64x32xf32>, vector<64x32xf32>, vector<64x32xf32>, vector<64x32xf32> -> vector<64x128xf32>
    %c0_17 = arith.constant 0 : index
    %c0_18 = arith.constant 0 : index
    %28 = vector.load %arg8[%c0_17, %c0_18] : memref<64x128xf32, #tpu.memory_space<vmem>>, vector<64x128xf32>
    tpu.vector_store %arg8[%c0_17, %c0_18], %27 {strides = array<i32>} : memref<64x128xf32, #tpu.memory_space<vmem>>, vector<64x128xf32>,
    return
  }
  func.func @transform_0(%arg0: i32) -> (i32, i32) {
    %c0_i32 = arith.constant 0 : i32
    %c0_i32_0 = arith.constant 0 : i32
    return %arg0, %c0_i32 : i32, i32
  }
  func.func @transform_1(%arg0: i32) -> (i32, i32) {
    %c0_i32 = arith.constant 0 : i32
    %c0_i32_0 = arith.constant 0 : i32
    %c0_i32_1 = arith.constant 0 : i32
    return %c0_i32, %c0_i32_0 : i32, i32
  }
  func.func @transform_2(%arg0: i32) -> (i32, i32) {
    %c0_i32 = arith.constant 0 : i32
    %c0_i32_0 = arith.constant 0 : i32
    %c0_i32_1 = arith.constant 0 : i32
    return %c0_i32, %c0_i32_0 : i32, i32
  }
  func.func @transform_3(%arg0: i32) -> (i32, i32) {
    %c0_i32 = arith.constant 0 : i32
    %c0_i32_0 = arith.constant 0 : i32
    %c0_i32_1 = arith.constant 0 : i32
    return %c0_i32, %c0_i32_0 : i32, i32
  }
  func.func @transform_4(%arg0: i32) -> (i32, i32) {
    %c0_i32 = arith.constant 0 : i32
    %c0_i32_0 = arith.constant 0 : i32
    %c0_i32_1 = arith.constant 0 : i32
    return %c0_i32, %c0_i32_0 : i32, i32
  }
  func.func @transform_5(%arg0: i32) -> (i32, i32) {
    %c0_i32 = arith.constant 0 : i32
    %c0_i32_0 = arith.constant 0 : i32
    %c0_i32_1 = arith.constant 0 : i32
    return %c0_i32, %c0_i32_0 : i32, i32
  }
  func.func @transform_6(%arg0: i32) -> (i32, i32) {
    %c0_i32 = arith.constant 0 : i32
    %c0_i32_0 = arith.constant 0 : i32
    %c0_i32_1 = arith.constant 0 : i32
    return %c0_i32, %c0_i32_0 : i32, i32
  }
  func.func @transform_7(%arg0: i32) -> (i32, i32) {
    %c0_i32 = arith.constant 0 : i32
    %c0_i32_0 = arith.constant 0 : i32
    return %arg0, %c0_i32 : i32, i32
  }
}

</mosaic_0001>

<bundles_post_ra>
// kernel: projection_nets_forward.1
= control target key start
LH: loop header
LB: loop body
LE: loop exit
PB: predicated region body
PF: predicated region fallthrough
CT: control target
= control target key end

     0   :  { %vm38_vm0 = vcmask 261120   ;;  %vm206_vm1 = vcmask 523264   ;;  %s1728_s13 = smov 32   ;;  %s2633_s1 = inlined_call_operand.vmem [shape: f32[32,128], index: 1, kind: input, shape index: {}]   ;;  %s2634_s0 = inlined_call_operand.vmem [shape: f32[64,32], index: 0, kind: input, shape index: {}]   ;;  %s2635_s3 = inlined_call_operand.vmem [shape: f32[64,64], index: 3, kind: input, shape index: {}]   ;;  %s2636_s2 = inlined_call_operand.vmem [shape: f32[1,64], index: 2, kind: input, shape index: {}]   ;;  %s2637_s5 = inlined_call_operand.vmem [shape: f32[64,64], index: 5, kind: input, shape index: {}]   ;;  %s2638_s4 = inlined_call_operand.vmem [shape: f32[1,64], index: 4, kind: input, shape index: {}]   ;;  %s2639_s6 = inlined_call_operand.vmem [shape: f32[1,64], index: 6, kind: input, shape index: {}]   ;;  %s2640_s7 = inlined_call_operand.vmem [shape: f32[64,128], index: 7, kind: output, shape index: {}]  }
   0x1   :  { %v34_v0 = vld [vmem:[%s2633_s1] sm:$0xff]  ;;  %v35_v1 = vld [vmem:[%s2633_s1 + $0x8] sm:$0xff]  ;;  %v36_v2 = vld [vmem:[%s2633_s1 + $0x10] sm:$0xff] }
   0x2   :  { %v1600_v3 = vpack.c.bf16 %v35_v1, %v34_v0  ;;  %v37_v4 = vld [vmem:[%s2633_s1 + $0x18] sm:$0xff]  ;;  %v26_v5 = vld [vmem:[%s2634_s0] sm:$0xff]  ;;  %v192_v8 = vld [vmem:[%s2635_s3 + $0x8] sm:$0xff] }
   0x3   :  { %v1604_v6 = vpack.c.bf16 %v37_v4, %v36_v2  ;;  %1532 = vmatprep.mubr.msk.f32.mxu0 %vm38_vm0, %v26_v5  ;;  %v191_v7 = vld [vmem:[%s2635_s3] sm:$0xff]  ;;  %v193_v9 = vld [vmem:[%s2635_s3 + $0x10] sm:$0xff]  ;;  %v194_v11 = vld [vmem:[%s2635_s3 + $0x18] sm:$0xff]  ;;  %v1721_v5 = vmov 683565275  }
   0x4   :  { %1601 = vmatprep.subr.bf16.mxu0 %v1600_v3  ;;  %v1608_v10 = vpack.c.bf16 %v192_v8, %v191_v7  ;;  %v1612_v12 = vpack.c.bf16 %v194_v11, %v193_v9  ;;  %v195_v13 = vld [vmem:[%s2635_s3 + $0x20] sm:$0xff]  ;;  %v196_v14 = vld [vmem:[%s2635_s3 + $0x28] sm:$0xff]  ;;  %v28_v16 = vld [vmem:[%s2634_s0 + $0x10] sm:$0xff]  ;;  %v1722_v7 = vmov 2475754826  }
   0x5   :  { %1603 = vmatpush3.bf16.msra.mxu0 %v1600_v3  ;;  %v27_v15 = vld [vmem:[%s2634_s0 + $0x8] sm:$0xff]  ;;  %v1616_v17 = vpack.c.bf16 %v196_v14, %v195_v13  ;;  %v29_v18 = vld [vmem:[%s2634_s0 + $0x18] sm:$0xff]  ;;  %v30_v19 = vld [vmem:[%s2634_s0 + $0x20] sm:$0xff]  ;;  %v1723_v11 = vmov 2131351028  }
   0x6   :  { %1605 = vmatprep.subr.bf16.mxu0 %v1604_v6  ;;  %1609 = vmatprep.subr.bf16.mxu1 %v1608_v10  ;;  %v31_v20 = vld [vmem:[%s2634_s0 + $0x28] sm:$0xff]  ;;  %v32_v21 = vld [vmem:[%s2634_s0 + $0x30] sm:$0xff]  ;;  %v33_v22 = vld [vmem:[%s2634_s0 + $0x38] sm:$0xff]  ;;  %v1724_v13 = vmov 2102212464  }
   0x7   :  { %1611 = vmatpush3.bf16.msra.mxu1 %v1608_v10  ;;  %v197_v23 = vld [vmem:[%s2635_s3 + $0x30] sm:$0xff]  ;;  %v198_v24 = vld [vmem:[%s2635_s3 + $0x38] sm:$0xff]  ;;  %v1840_v26 = vld [vmem:[%s2636_s2] ss:$0 sm:$0xff] }
   0x8   :  { %1613 = vmatprep.subr.bf16.mxu1 %v1612_v12  ;;  %v1620_v25 = vpack.c.bf16 %v198_v24, %v197_v23 }
   0x9   :  { %1607 = vmatpush3.bf16.msra.mxu0 %v1604_v6 }
   0xb   :  { %1615 = vmatpush3.bf16.msra.mxu1 %v1612_v12 }
   0xc   :  { %1533 = vmatmul.mubr.msk.f32.vlgmr.msra.gmra.mrb[0].mxu0 %vm38_vm0, %v27_v15  ;;  %1617 = vmatprep.subr.bf16.mxu1 %v1616_v17  ;;  %v1725_v15 = vmov 920167782  }
   0xd   :  { %1535 = vmatprep.mubr.msk.f32.mxu0 %vm38_vm0, %v28_v16 }
   0xf   :  { %1619 = vmatpush3.bf16.msra.mxu1 %v1616_v17 }
  0x10   :  { %1536 = vmatmul.mubr.msk.f32.gmra.mrb[2].mxu0 %vm38_vm0, %v29_v18  ;;  %1621 = vmatprep.subr.bf16.mxu1 %v1620_v25 }
  0x11   :  { %1538 = vmatprep.mubr.msk.f32.mxu0 %vm38_vm0, %v30_v19 }
  0x13   :  { %1623 = vmatpush3.bf16.msra.mxu1 %v1620_v25 }
  0x14   :  { %1539 = vmatmul.mubr.msk.f32.gmra.mrb[4].mxu0 %vm38_vm0, %v31_v20 }
  0x15   :  { %1541 = vmatprep.mubr.msk.f32.mxu0 %vm38_vm0, %v32_v21 }
  0x18   :  { %1542 = vmatmul.mubr.msk.f32.gmra.mrb[6].mxu0 %vm38_vm0, %v33_v22  ;;  %v1726_v22 = vmov 1326507024  }
  0xdf   :  { %v1842_v27 = vpop.f32.mrb[0].mxu0 }
  0xe0   :  { %v592_v28 = vand.u32 2147483647, %v1842_v27  ;;  %v595_v29 = vand.u32 2139095040, %v1842_v27  ;;  %v1846_v30 = vpop.f32.mrb[1].mxu0  ;;  %v176_v31 = vadd.f32 %v1842_v27, %v1840_v26 }
  0xe1   :  { %v488_v32 = vand.u32 2147483647, %v1846_v30  ;;  %v491_v33 = vand.u32 2139095040, %v1846_v30  ;;  %v175_v34 = vadd.f32 %v1840_v26, %v1846_v30 }
  0xe2   :  { %v596_v35 = vshrl.u32 %v595_v29, 23  ;;  %v599_v36 = vand.u32 8388607, %v592_v28  ;;  %v184_v44 = vmax.f32 %v176_v31, 0.0 }
  0xe3   :  { %v492_v37 = vshrl.u32 %v491_v33, 23  ;;  %v495_v38 = vand.u32 8388607, %v488_v32  ;;  %v1858_v39 = vpop.f32.mrb[2].mxu0  ;;  %v183_v40 = vmax.f32 %v175_v34, 0.0 }
  0xe4   :  { %v1452_v41 = vadd.s32 4294967169, %v596_v35  ;;  %v800_v42 = vand.u32 2147483647, %v1858_v39  ;;  %v1861_v43 = vpop.f32.mrb[3].mxu0  ;;  %v600_v45 = vor.u32 8388608, %v599_v36  ;;  %v803_v47 = vand.u32 2139095040, %v1858_v39 }
  0xe5   :  { %v1448_v46 = vadd.s32 4294967169, %v492_v37  ;;  %1560 = vmatprep.mubr.msk.f32.mxu1 %vm206_vm1, %v183_v40  ;;  %v496_v49 = vor.u32 8388608, %v495_v38  ;;  %v696_v54 = vand.u32 2147483647, %v1861_v43  ;;  %v699_v2 = vand.u32 2139095040, %v1861_v43 }
  0xe6   :  { %v602_v48 = vadd.s32 1, %v1452_v41  ;;  %1561 = vmatmul.mubr.msk.f32.vlgmr.msra.gmra.mrb[0].mxu1 %vm206_vm1, %v184_v44  ;;  %v804_v51 = vshrl.u32 %v803_v47, 23  ;;  %v1868_v52 = vand.u32 8388607, %v800_v42  ;;  %v1873_v56 = vshll.u32 %v600_v45, 8 }
  0xe7   :  { %v498_v50 = vadd.s32 1, %v1448_v46  ;;  %v1870_v53 = vpop.f32.mrb[4].mxu0  ;;  %v1877_v62 = vshll.u32 %v496_v49, 8 }
  0xe8   :  { %vm603_vm2 = vcmp.gt.s32.totalorder %v602_v48, 0  ;;  %v1460_v57 = vadd.s32 4294967169, %v804_v51  ;;  %v1875_v58 = vpop.f32.mrb[5].mxu0  ;;  %v808_v1 = vor.u32 8388608, %v1868_v52 }
  0xe9   :  { %v604_v55 = vsel %vm603_vm2, %v602_v48, 0  ;;  %vm499_vm3 = vcmp.gt.s32.totalorder %v498_v50, 0 }
  0xea   :  { %v605_v59 = vshrl.u32 %v604_v55, 5  ;;  %v606_v60 = vand.u32 31, %v604_v55  ;;  %v500_v61 = vsel %vm499_vm3, %v498_v50, 0  ;;  %v1889_v9 = vadd.s32 1, %v1460_v57 }
  0xeb   :  { %v1879_v63 = vshrl.u32 %v500_v61, 5  ;;  %v1881_v0 = vand.u32 31, %v500_v61  ;;  %v1885_v3 = vpop.f32.mrb[6].mxu0 }
  0xec   :  { %v607_v4 = vsub.s32 32, %v606_v60  ;;  %v609_v6 = vshll.u32 %v1721_v5, %v606_v60  ;;  %v612_v8 = vshll.u32 %v1722_v7, %v606_v60  ;;  %v1891_v10 = vpop.f32.mrb[7].mxu0  ;;  %v615_v12 = vshll.u32 %v1723_v11, %v606_v60 }
  0xed   :  { %v618_v14 = vshll.u32 %v1724_v13, %v606_v60  ;;  %v621_v16 = vshll.u32 %v1725_v15, %v606_v60  ;;  %vm624_vm4 = vcmp.lt.s32.totalorder %v605_v59, 1  ;;  %vm625_vm5 = vcmp.lt.s32.totalorder %v605_v59, 2 }
  0xee   :  { %v610_v17 = vshrl.u32 %v1722_v7, %v607_v4  ;;  %v613_v18 = vshrl.u32 %v1723_v11, %v607_v4  ;;  %v616_v19 = vshrl.u32 %v1724_v13, %v607_v4  ;;  %v608_v20 = vshrl.u32 %v1721_v5, %v607_v4 }
  0xef   :  { %v619_v21 = vshrl.u32 %v1725_v15, %v607_v4  ;;  %v622_v23 = vshrl.u32 %v1726_v22, %v607_v4  ;;  %vm626_vm6 = vcmp.lt.s32.totalorder %v605_v59, 3  ;;  %v503_v31 = vsub.s32 32, %v1881_v0 }
  0xf0   :  { %v611_v24 = vor.u32 %v610_v17, %v609_v6  ;;  %v614_v25 = vor.u32 %v613_v18, %v612_v8  ;;  %v617_v29 = vor.u32 %v616_v19, %v615_v12  ;;  %vm627_vm7 = vcmp.lt.s32.totalorder %v605_v59, 4 }
  0xf1   :  { %v620_v33 = vor.u32 %v619_v21, %v618_v14  ;;  %v623_v34 = vor.u32 %v622_v23, %v621_v16  ;;  %v505_v35 = vshll.u32 %v1721_v5, %v1881_v0  ;;  %v508_v46 = vshll.u32 %v1722_v7, %v1881_v0 }
  0xf2   :  { %v628_v36 = vsel %vm624_vm4, %v608_v20, %v611_v24  ;;  %v629_v37 = vsel %vm627_vm7, %v617_v29, 2102212464  ;;  %v632_v38 = vsel %vm624_vm4, %v611_v24, %v614_v25  ;;  %v636_v40 = vsel %vm624_vm4, %v614_v25, %v617_v29 }
  0xf3   :  { %v630_v41 = vsel %vm626_vm6, %v614_v25, %v629_v37  ;;  %v633_v44 = vsel %vm627_vm7, %v620_v33, 920167782  ;;  %v637_v45 = vsel %vm627_vm7, %v623_v34, 1326507024  ;;  %v504_v49 = vshrl.u32 %v1721_v5, %v503_v31 }
  0xf4   :  { %v634_v47 = vsel %vm626_vm6, %v617_v29, %v633_v44  ;;  %v638_v48 = vsel %vm626_vm6, %v620_v33, %v637_v45  ;;  %v506_v50 = vshrl.u32 %v1722_v7, %v503_v31  ;;  %v631_v51 = vsel %vm625_vm5, %v628_v36, %v630_v41 }
  0xf5   :  { %v635_v55 = vsel %vm625_vm5, %v632_v38, %v634_v47  ;;  %v639_v57 = vsel %vm625_vm5, %v636_v40, %v638_v48  ;;  %v509_v60 = vshrl.u32 %v1723_v11, %v503_v31  ;;  %v511_v16 = vshll.u32 %v1723_v11, %v1881_v0 }
  0xf6   :  { %v1920_v61 = vmul.u32.u64.low %v1873_v56, %v639_v57  ;;  %v1921_v4 = vmul.u32.u64.high %v1873_v56, %v639_v57, %v1920_v61  ;;  %v1924_v6 = vmul.u32.u64.low %v1873_v56, %v635_v55  ;;  %v1925_v8 = vmul.u32.u64.high %v1873_v56, %v635_v55, %v1924_v6 }
  0xf7   :  { %v507_v12 = vor.u32 %v506_v50, %v505_v35  ;;  %v510_v14 = vor.u32 %v509_v60, %v508_v46  ;;  %v512_v17 = vshrl.u32 %v1724_v13, %v503_v31  ;;  %v647_v59 = vmul.u32 %v1873_v56, %v631_v51 }
  0xf8   :  { %v514_v18 = vshll.u32 %v1724_v13, %v1881_v0  ;;  %v515_v19 = vshrl.u32 %v1725_v15, %v503_v31  ;;  %v518_v20 = vshrl.u32 %v1726_v22, %v503_v31  ;;  %v517_v23 = vshll.u32 %v1725_v15, %v1881_v0 }
  0xf9   :  { %v513_v21 = vor.u32 %v512_v17, %v511_v16  ;;  %vm520_vm8 = vcmp.lt.s32.totalorder %v1879_v63, 1  ;;  %vm521_vm9 = vcmp.lt.s32.totalorder %v1879_v63, 2  ;;  %vm649_vm10 = vc.u32 %v1921_v4, %v1924_v6 }
  0xfa   :  { %v650_v56 = vadd.s32 1, %v1925_v8  ;;  %v516_v24 = vor.u32 %v515_v19, %v514_v18  ;;  %vm522_vm11 = vcmp.lt.s32.totalorder %v1879_v63, 3  ;;  %v519_v25 = vor.u32 %v518_v20, %v517_v23 }
  0xfb   :  { %vm523_vm12 = vcmp.lt.s32.totalorder %v1879_v63, 4  ;;  %v524_v29 = vsel %vm520_vm8, %v504_v49, %v507_v12  ;;  %v528_v31 = vsel %vm520_vm8, %v507_v12, %v510_v14  ;;  %v532_v35 = vsel %vm520_vm8, %v510_v14, %v513_v21 }
  0xfc   :  { %v651_v33 = vsel %vm649_vm10, %v650_v56, %v1925_v8  ;;  %v525_v0 = vsel %vm523_vm12, %v513_v21, 2102212464  ;;  %v529_v34 = vsel %vm523_vm12, %v516_v24, 920167782  ;;  %v533_v40 = vsel %vm523_vm12, %v519_v25, 1326507024 }
  0xfd   :  { %v652_v36 = vadd.s32 %v651_v33, %v647_v59  ;;  %v526_v37 = vsel %vm522_vm11, %v510_v14, %v525_v0  ;;  %v530_v38 = vsel %vm522_vm11, %v513_v21, %v529_v34  ;;  %v534_v44 = vsel %vm522_vm11, %v516_v24, %v533_v40 }
  0xfe   :  { %v531_v41 = vsel %vm521_vm9, %v528_v31, %v530_v38  ;;  %vm811_vm13 = vcmp.gt.s32.totalorder %v1889_v9, 0  ;;  %v700_v45 = vshrl.u32 %v699_v2, 23  ;;  %v535_v47 = vsel %vm521_vm9, %v532_v35, %v534_v44 }
  0xff   :  { %v653_v46 = vadd.s32 536870912, %v652_v36  ;;  %v1954_v48 = vmul.u32.u64.low %v1877_v62, %v531_v41  ;;  %v1955_v49 = vmul.u32.u64.high %v1877_v62, %v531_v41, %v1954_v48  ;;  %v527_v50 = vsel %vm521_vm9, %v524_v29, %v526_v37 }
 0x100   :  { %v1961_v51 = vmul.u32.u64.low %v1877_v62, %v535_v47  ;;  %v1962_v55 = vmul.u32.u64.high %v1877_v62, %v535_v47, %v1961_v51  ;;  %v812_v57 = vsel %vm811_vm13, %v1889_v9, 0  ;;  %v1969_v61 = vshll.u32 %v808_v1, 8 }
 0x101   :  { %v1965_v60 = vshrl.u32 %v653_v46, 30  ;;  %v814_v2 = vand.u32 31, %v812_v57  ;;  %v1456_v8 = vadd.s32 4294967169, %v700_v45  ;;  %v1973_v12 = vand.u32 8388607, %v696_v54 }
 0x102   :  { %v543_v14 = vmul.u32 %v1877_v62, %v527_v50  ;;  %v546_v16 = vadd.s32 1, %v1955_v49  ;;  %vm545_vm14 = vc.u32 %v1962_v55, %v1954_v48  ;;  %v813_v9 = vshrl.u32 %v812_v57, 5 }
 0x103   :  { %v655_v63 = vshll.u32 %v1965_v60, 30  ;;  %v815_v17 = vsub.s32 32, %v814_v2  ;;  %v817_v52 = vshll.u32 %v1721_v5, %v814_v2  ;;  %v820_v1 = vshll.u32 %v1722_v7, %v814_v2 }
 0x104   :  { %v547_v18 = vsel %vm545_vm14, %v546_v16, %v1955_v49  ;;  %v823_v20 = vshll.u32 %v1723_v11, %v814_v2  ;;  %v826_v56 = vshll.u32 %v1724_v13, %v814_v2  ;;  %v829_v31 = vshll.u32 %v1725_v15, %v814_v2 }
 0x105   :  { %v1982_v59 = vsub.s32 %v652_v36, %v655_v63  ;;  %v818_v19 = vshrl.u32 %v1722_v7, %v815_v17  ;;  %v548_v62 = vadd.s32 %v547_v18, %v543_v14  ;;  %v821_v21 = vshrl.u32 %v1723_v11, %v815_v17 }
 0x106   :  { %v824_v23 = vshrl.u32 %v1724_v13, %v815_v17  ;;  %v827_v29 = vshrl.u32 %v1725_v15, %v815_v17  ;;  %v830_v35 = vshrl.u32 %v1726_v22, %v815_v17  ;;  %v816_v37 = vshrl.u32 %v1721_v5, %v815_v17 }
 0x107   :  { %v658_v24 = vsub.s32 0, %v1982_v59  ;;  %v819_v25 = vor.u32 %v818_v19, %v817_v52  ;;  %v549_v33 = vadd.s32 536870912, %v548_v62  ;;  %v822_v0 = vor.u32 %v821_v21, %v820_v1 }
 0x108   :  { %v825_v34 = vor.u32 %v824_v23, %v823_v20  ;;  %v828_v38 = vor.u32 %v827_v29, %v826_v56  ;;  %v706_v40 = vadd.s32 1, %v1456_v8  ;;  %v831_v44 = vor.u32 %v830_v35, %v829_v31 }
 0x109   :  { %v1453_v36 = vmin.u32 %v658_v24, %v1982_v59  ;;  %v1996_v41 = vshrl.u32 %v549_v33, 30  ;;  %vm832_vm15 = vcmp.lt.s32.totalorder %v813_v9, 1  ;;  %vm835_vm2 = vcmp.lt.s32.totalorder %v813_v9, 4 }
 0x10a   :  { %vm833_vm3 = vcmp.lt.s32.totalorder %v813_v9, 2  ;;  %v837_v46 = vsel %vm835_vm2, %v825_v34, 2102212464  ;;  %v840_v47 = vsel %vm832_vm15, %v819_v25, %v822_v0  ;;  %vm834_vm4 = vcmp.lt.s32.totalorder %v813_v9, 3 }
 0x10b   :  { %v660_v45 = vclz %v1453_v36  ;;  %v551_v49 = vshll.u32 %v1996_v41, 30  ;;  %v841_v50 = vsel %vm835_vm2, %v828_v38, 920167782  ;;  %v844_v51 = vsel %vm832_vm15, %v822_v0, %v825_v34 }
 0x10c   :  { %v836_v2 = vsel %vm832_vm15, %v816_v37, %v819_v25  ;;  %v842_v63 = vsel %vm834_vm4, %v825_v34, %v841_v50  ;;  %v845_v14 = vsel %vm835_vm2, %v831_v44, 1326507024  ;;  %v838_v8 = vsel %vm834_vm4, %v822_v0, %v837_v46 }
 0x10d   :  { %v1454_v57 = vadd.s32 4294967294, %v660_v45  ;;  %v1999_v16 = vsub.s32 %v548_v62, %v551_v49  ;;  %v843_v17 = vsel %vm833_vm3, %v840_v47, %v842_v63  ;;  %v846_v52 = vsel %vm834_vm4, %v828_v38, %v845_v14 }
 0x10e   :  { %v847_v1 = vsel %vm833_vm3, %v844_v51, %v846_v52  ;;  %v2004_v18 = vmul.u32.u64.low %v1969_v61, %v843_v17  ;;  %v2005_v19 = vmul.u32.u64.high %v1969_v61, %v843_v17, %v2004_v18  ;;  %v839_v24 = vsel %vm833_vm3, %v836_v2, %v838_v8 }
 0x10f   :  { %vm1455_vm5 = vcmp.lt.s32.totalorder %v1454_v57, 0  ;;  %v554_v21 = vsub.s32 0, %v1999_v16  ;;  %v2010_v23 = vmul.u32.u64.low %v1969_v61, %v847_v1  ;;  %v2011_v56 = vmul.u32.u64.high %v1969_v61, %v847_v1, %v2010_v23 }
 0x110   :  { %v663_v20 = vsel %vm1455_vm5, 0, %v1454_v57  ;;  %vm707_vm6 = vcmp.gt.s32.totalorder %v706_v40, 0  ;;  %v2642_v25 = vand.u32 2147483647, %v1870_v53  ;;  %v648_v29 = vadd.s32 %v1924_v6, %v1921_v4 }
 0x111   :  { %v668_v62 = vsub.s32 4294967266, %v663_v20  ;;  %v1449_v31 = vmin.u32 %v554_v21, %v1999_v16  ;;  %v708_v33 = vsel %vm707_vm6, %v706_v40, 0  ;;  %v664_v0 = vsub.s32 32, %v663_v20 }
 0x112   :  { %v858_v35 = vadd.s32 1, %v2005_v19  ;;  %v704_v36 = vor.u32 8388608, %v1973_v12  ;;  %v855_v38 = vmul.u32 %v1969_v61, %v839_v24  ;;  %vm857_vm7 = vc.u32 %v2011_v56, %v2004_v18 }
 0x113   :  { %v669_v34 = vadd.s32 127, %v668_v62  ;;  %v556_v37 = vclz %v1449_v31  ;;  %v710_v9 = vand.u32 31, %v708_v33  ;;  %v544_v44 = vadd.s32 %v1954_v48, %v1962_v55 }
 0x114   :  { %v859_v4 = vsel %vm857_vm7, %v858_v35, %v2005_v19  ;;  %v1011_v6 = vand.u32 2139095040, %v1870_v53  ;;  %v2029_v40 = vand.u32 8388607, %v2642_v25  ;;  %v665_v12 = vshll.u32 %v1982_v59, %v663_v20 }
 0x115   :  { %v1450_v45 = vadd.s32 4294967294, %v556_v37  ;;  %v860_v46 = vadd.s32 %v859_v4, %v855_v38  ;;  %v711_v61 = vsub.s32 32, %v710_v9  ;;  %v666_v47 = vshrl.u32 %v648_v29, %v664_v0 }
 0x116   :  { %v670_v49 = vshll.u32 %v669_v34, 23  ;;  %v2032_v50 = vshrl.u32 %v708_v33, 5  ;;  %v2034_v51 = vshll.u32 %v704_v36, 8  ;;  %v713_v55 = vshll.u32 %v1721_v5, %v710_v9 }
 0x117   :  { %vm1451_vm8 = vcmp.lt.s32.totalorder %v1450_v45, 0  ;;  %v861_v48 = vadd.s32 536870912, %v860_v46  ;;  %v714_v57 = vshrl.u32 %v1722_v7, %v711_v61  ;;  %v716_v63 = vshll.u32 %v1722_v7, %v710_v9 }
 0x118   :  { %v559_v2 = vsel %vm1451_vm8, 0, %v1450_v45  ;;  %v717_v59 = vshrl.u32 %v1723_v11, %v711_v61  ;;  %v720_v14 = vshrl.u32 %v1724_v13, %v711_v61  ;;  %v719_v1 = vshll.u32 %v1723_v11, %v710_v9 }
 0x119   :  { %v560_v8 = vsub.s32 32, %v559_v2  ;;  %v564_v17 = vsub.s32 4294967266, %v559_v2  ;;  %v2041_v52 = vshrl.u32 %v861_v48, 30  ;;  %v667_v19 = vor.u32 %v666_v47, %v665_v12 }
 0x11a   :  { %v671_v20 = vor.u32 4788187, %v670_v49  ;;  %v715_v21 = vor.u32 %v714_v57, %v713_v55  ;;  %v1012_v23 = vshrl.u32 %v1011_v6, 23  ;;  %v718_v29 = vor.u32 %v717_v59, %v716_v63 }
 0x11b   :  { %v565_v62 = vadd.s32 127, %v564_v17  ;;  %v863_v24 = vshll.u32 %v2041_v52, 30  ;;  %v721_v31 = vor.u32 %v720_v14, %v719_v1  ;;  %v722_v33 = vshll.u32 %v1724_v13, %v710_v9 }
 0x11c   :  { %v723_v0 = vshrl.u32 %v1725_v15, %v711_v61  ;;  %v725_v34 = vshll.u32 %v1725_v15, %v710_v9  ;;  %v726_v35 = vshrl.u32 %v1726_v22, %v711_v61  ;;  %v562_v36 = vshrl.u32 %v544_v44, %v560_v8 }
 0x11d   :  { %v566_v37 = vshll.u32 %v565_v62, 23  ;;  %v2049_v38 = vsub.s32 %v860_v46, %v863_v24  ;;  %vm728_vm9 = vcmp.lt.s32.totalorder %v2032_v50, 1  ;;  %v672_v4 = vand.u32 2147483647, %v671_v20 }
 0x11e   :  { %v712_v6 = vshrl.u32 %v1721_v5, %v711_v61  ;;  %v724_v12 = vor.u32 %v723_v0, %v722_v33  ;;  %v727_v45 = vor.u32 %v726_v35, %v725_v34  ;;  %v561_v47 = vshll.u32 %v1999_v16, %v559_v2 }
 0x11f   :  { %v567_v49 = vor.u32 4788187, %v566_v37  ;;  %v866_v48 = vsub.s32 0, %v2049_v38  ;;  %vm731_vm10 = vcmp.lt.s32.totalorder %v2032_v50, 4  ;;  %vm730_vm11 = vcmp.lt.s32.totalorder %v2032_v50, 3 }
 0x120   :  { %v733_v9 = vsel %vm731_vm10, %v721_v31, 2102212464  ;;  %v736_v44 = vsel %vm728_vm9, %v715_v21, %v718_v29  ;;  %v737_v46 = vsel %vm731_vm10, %v724_v12, 920167782  ;;  %v563_v55 = vor.u32 %v562_v36, %v561_v47 }
 0x121   :  { %v1461_v57 = vmin.u32 %v866_v48, %v2049_v38  ;;  %vm729_vm12 = vcmp.lt.s32.totalorder %v2032_v50, 2  ;;  %v738_v61 = vsel %vm730_vm11, %v721_v31, %v737_v46  ;;  %v732_v16 = vsel %vm728_vm9, %v712_v6, %v715_v21 }
 0x122   :  { %v739_v2 = vsel %vm729_vm12, %v736_v44, %v738_v61  ;;  %v740_v63 = vsel %vm728_vm9, %v718_v29, %v721_v31  ;;  %v741_v59 = vsel %vm731_vm10, %v727_v45, 1326507024  ;;  %v568_v14 = vand.u32 2147483647, %v567_v49 }
 0x123   :  { %v868_v8 = vclz %v1461_v57  ;;  %v734_v17 = vsel %vm730_vm11, %v718_v29, %v733_v9  ;;  %v742_v1 = vsel %vm730_vm11, %v724_v12, %v741_v59  ;;  %v1468_v33 = vadd.s32 4294967169, %v1012_v23 }
 0x124   :  { %v743_v20 = vsel %vm729_vm12, %v740_v63, %v742_v1  ;;  %v2070_v62 = vmul.u32.u64.low %v2034_v51, %v739_v2  ;;  %v2071_v24 = vmul.u32.u64.high %v2034_v51, %v739_v2, %v2070_v62  ;;  %v674_v21 = vcvt.s32.f32 %v667_v19 }
 0x125   :  { %v1462_v0 = vadd.s32 4294967294, %v868_v8  ;;  %v2074_v34 = vmul.u32.u64.low %v2034_v51, %v743_v20  ;;  %v2075_v35 = vmul.u32.u64.high %v2034_v51, %v743_v20, %v2074_v34  ;;  %v570_v31 = vcvt.s32.f32 %v563_v55 }
 0x126   :  { %v856_v36 = vadd.s32 %v2004_v18, %v2011_v56  ;;  %v1018_v29 = vadd.s32 1, %v1468_v33  ;;  %v2079_v37 = vmul.f32 %v674_v21, %v672_v4  ;;  %v735_v6 = vsel %vm729_vm12, %v732_v16, %v734_v17 }
 0x127   :  { %vm1463_vm13 = vcmp.lt.s32.totalorder %v1462_v0, 0  ;;  %v907_v12 = vand.u32 2139095040, %v1875_v58  ;;  %v2084_v23 = vmul.f32 %v570_v31, %v568_v14  ;;  %v754_v45 = vadd.s32 1, %v2071_v24 }
 0x128   :  { %v871_v19 = vsel %vm1463_vm13, 0, %v1462_v0  ;;  %vm1019_vm14 = vcmp.gt.s32.totalorder %v1018_v29, 0  ;;  %v1016_v48 = vor.u32 8388608, %v2029_v40  ;;  %v904_v18 = vand.u32 2147483647, %v1875_v58 }
 0x129   :  { %v872_v47 = vsub.s32 32, %v871_v19  ;;  %v876_v49 = vsub.s32 4294967266, %v871_v19  ;;  %v751_v56 = vmul.u32 %v2034_v51, %v735_v6  ;;  %vm753_vm15 = vc.u32 %v2075_v35, %v2070_v62 }
 0x12a   :  { %v1020_v50 = vsel %vm1019_vm14, %v1018_v29, 0  ;;  %v908_v4 = vshrl.u32 %v907_v12, 23  ;;  %v676_v9 = vxor.u32 2147483648, %v2079_v37  ;;  %v755_v55 = vsel %vm753_vm15, %v754_v45, %v2071_v24 }
 0x12b   :  { %v874_v44 = vshrl.u32 %v856_v36, %v872_v47  ;;  %v877_v46 = vadd.s32 127, %v876_v49  ;;  %v572_v57 = vxor.u32 2147483648, %v2084_v23  ;;  %v756_v61 = vadd.s32 %v755_v55, %v751_v56 }
 0x12c   :  { %v1022_v16 = vand.u32 31, %v1020_v50  ;;  %v2096_v40 = vadd.f32 %v1840_v26, %v1861_v43  ;;  %v873_v51 = vshll.u32 %v2049_v38, %v871_v19  ;;  %v2100_v2 = vadd.s32 %v2070_v62, %v2075_v35 }
 0x12d   :  { %v2102_v63 = vshll.u32 %v1016_v48, 8  ;;  %v2106_v59 = vand.u32 8388607, %v904_v18  ;;  %v757_v14 = vadd.s32 536870912, %v756_v61  ;;  %v1021_v8 = vshrl.u32 %v1020_v50, 5 }
 0x12e   :  { %v1023_v17 = vsub.s32 32, %v1022_v16  ;;  %v1464_v1 = vadd.s32 4294967169, %v908_v4  ;;  %v875_v20 = vor.u32 %v874_v44, %v873_v51  ;;  %v878_v24 = vshll.u32 %v877_v46, 23 }
 0x12f   :  { %v1025_v33 = vshll.u32 %v1721_v5, %v1022_v16  ;;  %v1028_v21 = vshll.u32 %v1722_v7, %v1022_v16  ;;  %v2110_v38 = vshrl.u32 %v757_v14, 30  ;;  %v1031_v34 = vshll.u32 %v1723_v11, %v1022_v16 }
 0x130   :  { %v1026_v62 = vshrl.u32 %v1722_v7, %v1023_v17  ;;  %v1029_v0 = vshrl.u32 %v1723_v11, %v1023_v17  ;;  %v1032_v35 = vshrl.u32 %v1724_v13, %v1023_v17  ;;  %v1034_v31 = vshll.u32 %v1724_v13, %v1022_v16 }
 0x131   :  { %v1035_v36 = vshrl.u32 %v1725_v15, %v1023_v17  ;;  %v1037_v29 = vshll.u32 %v1725_v15, %v1022_v16  ;;  %v759_v6 = vshll.u32 %v2110_v38, 30  ;;  %v1038_v45 = vshrl.u32 %v1726_v22, %v1023_v17 }
 0x132   :  { %v1027_v12 = vor.u32 %v1026_v62, %v1025_v33  ;;  %v1030_v19 = vor.u32 %v1029_v0, %v1028_v21  ;;  %v879_v47 = vor.u32 4788187, %v878_v24  ;;  %v1033_v49 = vor.u32 %v1032_v35, %v1031_v34 }
 0x133   :  { %v1036_v48 = vor.u32 %v1035_v36, %v1034_v31  ;;  %vm1040_vm2 = vcmp.lt.s32.totalorder %v1021_v8, 1  ;;  %v2121_v56 = vsub.s32 %v756_v61, %v759_v6  ;;  %v1024_v50 = vshrl.u32 %v1721_v5, %v1023_v17 }
 0x134   :  { %v1039_v4 = vor.u32 %v1038_v45, %v1037_v29  ;;  %vm1043_vm3 = vcmp.lt.s32.totalorder %v1021_v8, 4  ;;  %vm1042_vm4 = vcmp.lt.s32.totalorder %v1021_v8, 3  ;;  %v1048_v46 = vsel %vm1040_vm2, %v1027_v12, %v1030_v19 }
 0x135   :  { %v1045_v44 = vsel %vm1043_vm3, %v1033_v49, 2102212464  ;;  %v1049_v55 = vsel %vm1043_vm3, %v1036_v48, 920167782  ;;  %v762_v16 = vsub.s32 0, %v2121_v56  ;;  %vm1041_vm5 = vcmp.lt.s32.totalorder %v1021_v8, 2 }
 0x136   :  { %v1050_v51 = vsel %vm1042_vm4, %v1033_v49, %v1049_v55  ;;  %v1052_v14 = vsel %vm1040_vm2, %v1030_v19, %v1033_v49  ;;  %v1044_v33 = vsel %vm1040_vm2, %v1024_v50, %v1027_v12  ;;  %v1046_v24 = vsel %vm1042_vm4, %v1030_v19, %v1045_v44 }
 0x137   :  { %v1051_v21 = vsel %vm1041_vm5, %v1048_v46, %v1050_v51  ;;  %v1053_v62 = vsel %vm1043_vm3, %v1039_v4, 1326507024  ;;  %v1457_v61 = vmin.u32 %v762_v16, %v2121_v56  ;;  %v880_v35 = vand.u32 2147483647, %v879_v47 }
 0x138   :  { %v1054_v0 = vsel %vm1042_vm4, %v1036_v48, %v1053_v62  ;;  %v2128_v17 = vmul.u32.u64.low %v2102_v63, %v1051_v21  ;;  %v2129_v34 = vmul.u32.u64.high %v2102_v63, %v1051_v21, %v2128_v17  ;;  %v882_v31 = vcvt.s32.f32 %v875_v20 }
 0x139   :  { %v1055_v36 = vsel %vm1041_vm5, %v1052_v14, %v1054_v0  ;;  %v914_v29 = vadd.s32 1, %v1464_v1  ;;  %v764_v6 = vclz %v1457_v61  ;;  %v185_v45 = vmax.f32 %v2096_v40, 0.0 }
 0x13a   :  { %v2134_v12 = vmul.u32.u64.low %v2102_v63, %v1055_v36  ;;  %v2135_v19 = vmul.u32.u64.high %v2102_v63, %v1055_v36, %v2134_v12  ;;  %v1047_v49 = vsel %vm1041_vm5, %v1044_v33, %v1046_v24  ;;  %v178_v48 = vadd.f32 %v1858_v39, %v1840_v26 }
 0x13b   :  { %vm915_vm6 = vcmp.gt.s32.totalorder %v914_v29, 0  ;;  %v2641_v50 = vand.u32 2147483647, %v1885_v3  ;;  %v1458_v47 = vadd.s32 4294967294, %v764_v6  ;;  %v1066_v20 = vadd.s32 1, %v2129_v34  ;;  %1563 = vmatprep.mubr.msk.f32.mxu1 %vm206_vm1, %v185_v45 }
 0x13c   :  { %v916_v4 = vsel %vm915_vm6, %v914_v29, 0  ;;  %v1219_v1 = vand.u32 2139095040, %v1885_v3  ;;  %v2145_v44 = vmul.f32 %v882_v31, %v880_v35  ;;  %v912_v40 = vor.u32 8388608, %v2106_v59 }
 0x13d   :  { %v918_v8 = vand.u32 31, %v916_v4  ;;  %v186_v46 = vmax.f32 %v178_v48, 0.0  ;;  %vm1459_vm7 = vcmp.lt.s32.totalorder %v1458_v47, 0  ;;  %v1063_v55 = vmul.u32 %v2102_v63, %v1047_v49 }
 0x13e   :  { %vm1065_vm8 = vc.u32 %v2135_v19, %v2128_v17  ;;  %v917_v16 = vshrl.u32 %v916_v4, 5  ;;  %v767_v51 = vsel %vm1459_vm7, 0, %v1458_v47  ;;  %v2155_v24 = vand.u32 8388607, %v2641_v50 }
 0x13f   :  { %v1067_v14 = vsel %vm1065_vm8, %v1066_v20, %v2129_v34  ;;  %v919_v33 = vsub.s32 32, %v918_v8  ;;  %1564 = vmatmul.mubr.msk.f32.gmra.mrb[2].mxu1 %vm206_vm1, %v186_v46  ;;  %v768_v59 = vsub.s32 32, %v767_v51  ;;  %v772_v21 = vsub.s32 4294967266, %v767_v51 }
 0x140   :  { %v1068_v62 = vadd.s32 %v1067_v14, %v1063_v55  ;;  %v1220_v61 = vshrl.u32 %v1219_v1, 23  ;;  %v769_v63 = vshll.u32 %v2121_v56, %v767_v51  ;;  %v921_v0 = vshll.u32 %v1721_v5, %v918_v8 }
 0x141   :  { %v922_v35 = vshrl.u32 %v1722_v7, %v919_v33  ;;  %v925_v31 = vshrl.u32 %v1723_v11, %v919_v33  ;;  %v770_v34 = vshrl.u32 %v2100_v2, %v768_v59  ;;  %v773_v36 = vadd.s32 127, %v772_v21 }
 0x142   :  { %v1069_v29 = vadd.s32 536870912, %v1068_v62  ;;  %v924_v6 = vshll.u32 %v1722_v7, %v918_v8  ;;  %v927_v45 = vshll.u32 %v1723_v11, %v918_v8  ;;  %v928_v49 = vshrl.u32 %v1724_v13, %v919_v33 }
 0x143   :  { %v923_v12 = vor.u32 %v922_v35, %v921_v0  ;;  %v930_v48 = vshll.u32 %v1724_v13, %v918_v8  ;;  %v771_v56 = vor.u32 %v770_v34, %v769_v63  ;;  %v774_v47 = vshll.u32 %v773_v36, 23 }
 0x144   :  { %v2166_v20 = vshrl.u32 %v1069_v29, 30  ;;  %v931_v4 = vshrl.u32 %v1725_v15, %v919_v33  ;;  %v926_v1 = vor.u32 %v925_v31, %v924_v6  ;;  %v929_v46 = vor.u32 %v928_v49, %v927_v45 }
 0x145   :  { %v933_v2 = vshll.u32 %v1725_v15, %v918_v8  ;;  %v934_v55 = vshrl.u32 %v1726_v22, %v919_v33  ;;  %vm594_vm9 = vcmp.lt.s32.totalorder %v1842_v27, 0  ;;  %vm490_vm10 = vcmp.lt.s32.totalorder %v1846_v30, 0 }
 0x146   :  { %v775_v51 = vor.u32 4788187, %v774_v47  ;;  %v1071_v14 = vshll.u32 %v2166_v20, 30  ;;  %v920_v59 = vshrl.u32 %v1721_v5, %v919_v33  ;;  %v932_v21 = vor.u32 %v931_v4, %v930_v48 }
 0x147   :  { %v778_v63 = vcvt.s32.f32 %v771_v56  ;;  %v935_v0 = vor.u32 %v934_v55, %v933_v2  ;;  %vm936_vm11 = vcmp.lt.s32.totalorder %v917_v16, 1  ;;  %vm939_vm12 = vcmp.lt.s32.totalorder %v917_v16, 4 }
 0x148   :  { %v776_v35 = vand.u32 2147483647, %v775_v51  ;;  %v2175_v31 = vsub.s32 %v1068_v62, %v1071_v14  ;;  %vm938_vm13 = vcmp.lt.s32.totalorder %v917_v16, 3  ;;  %v941_v8 = vsel %vm939_vm12, %v929_v46, 2102212464 }
 0x149   :  { %v940_v34 = vsel %vm936_vm11, %v920_v59, %v923_v12  ;;  %v942_v36 = vsel %vm938_vm13, %v926_v1, %v941_v8  ;;  %v944_v29 = vsel %vm936_vm11, %v923_v12, %v926_v1  ;;  %v945_v6 = vsel %vm939_vm12, %v932_v21, 920167782 }
 0x14a   :  { %v1074_v45 = vsub.s32 0, %v2175_v31  ;;  %vm937_vm14 = vcmp.lt.s32.totalorder %v917_v16, 2  ;;  %v946_v33 = vsel %vm938_vm13, %v929_v46, %v945_v6  ;;  %v948_v49 = vsel %vm936_vm11, %v926_v1, %v929_v46 }
 0x14b   :  { %v947_v48 = vsel %vm937_vm14, %v944_v29, %v946_v33  ;;  %v949_v56 = vsel %vm939_vm12, %v935_v0, 1326507024  ;;  %v952_v47 = vshll.u32 %v912_v40, 8  ;;  %v1476_v4 = vadd.s32 4294967169, %v1220_v61 }
 0x14c   :  { %v2180_v2 = vmul.f32 %v778_v63, %v776_v35  ;;  %v1469_v62 = vmin.u32 %v1074_v45, %v2175_v31  ;;  %v943_v55 = vsel %vm937_vm14, %v940_v34, %v942_v36  ;;  %v950_v51 = vsel %vm938_vm13, %v932_v21, %v949_v56 }
 0x14d   :  { %v951_v14 = vsel %vm937_vm14, %v948_v49, %v950_v51  ;;  %v2184_v12 = vmul.u32.u64.low %v952_v47, %v947_v48  ;;  %v2185_v59 = vmul.u32.u64.high %v952_v47, %v947_v48, %v2184_v12  ;;  %v1226_v8 = vadd.s32 1, %v1476_v4 }
 0x14e   :  { %v1076_v50 = vclz %v1469_v62  ;;  %v2188_v6 = vmul.u32.u64.low %v952_v47, %v951_v14  ;;  %v2189_v1 = vmul.u32.u64.high %v952_v47, %v951_v14, %v2188_v6  ;;  %v1224_v40 = vor.u32 8388608, %v2155_v24 }
 0x14f   :  { %v2197_v61 = vsel %vm594_vm9, %v676_v9, %v2079_v37  ;;  %v2204_v16 = vsel %vm490_vm10, %v572_v57, %v2084_v23  ;;  %vm1227_vm15 = vcmp.gt.s32.totalorder %v1226_v8, 0  ;;  %v884_v46 = vxor.u32 2147483648, %v2145_v44 }
 0x150   :  { %v1064_v24 = vadd.s32 %v2128_v17, %v2135_v19  ;;  %v1470_v21 = vadd.s32 4294967294, %v1076_v50  ;;  %v1228_v63 = vsel %vm1227_vm15, %v1226_v8, 0  ;;  %v780_v0 = vxor.u32 2147483648, %v2180_v2 }
 0x151   :  { %v959_v35 = vmul.u32 %v952_v47, %v943_v55  ;;  %v962_v37 = vadd.s32 1, %v2185_v59  ;;  %v1230_v9 = vand.u32 31, %v1228_v63  ;;  %vm961_vm3 = vc.u32 %v2189_v1, %v2184_v12 }
 0x152   :  { %vm1471_vm2 = vcmp.lt.s32.totalorder %v1470_v21, 0  ;;  %v2213_v23 = vshll.u32 %v1224_v40, 8  ;;  %v2643_v57 = vand.u32 2147483647, %v1891_v10  ;;  %v1115_v19 = vand.u32 2139095040, %v1891_v10 }
 0x153   :  { %v1079_v34 = vsel %vm1471_vm2, 0, %v1470_v21  ;;  %v963_v36 = vsel %vm961_vm3, %v962_v37, %v2185_v59  ;;  %v1231_v17 = vsub.s32 32, %v1230_v9  ;;  %v2220_v33 = vadd.f32 %v1840_v26, %v1875_v58 }
 0x154   :  { %v1080_v50 = vsub.s32 32, %v1079_v34  ;;  %v1084_v29 = vsub.s32 4294967266, %v1079_v34  ;;  %v964_v45 = vadd.s32 %v963_v36, %v959_v35  ;;  %v1229_v49 = vshrl.u32 %v1228_v63, 5 }
 0x155   :  { %v1233_v48 = vshll.u32 %v1721_v5, %v1230_v9  ;;  %v1234_v56 = vshrl.u32 %v1722_v7, %v1231_v17  ;;  %v1237_v47 = vshrl.u32 %v1723_v11, %v1231_v17  ;;  %v1081_v4 = vshll.u32 %v2175_v31, %v1079_v34 }
 0x156   :  { %v1085_v62 = vadd.s32 127, %v1084_v29  ;;  %v965_v55 = vadd.s32 536870912, %v964_v45  ;;  %v1236_v51 = vshll.u32 %v1722_v7, %v1230_v9  ;;  %v1082_v14 = vshrl.u32 %v1064_v24, %v1080_v50 }
 0x157   :  { %v1235_v59 = vor.u32 %v1234_v56, %v1233_v48  ;;  %v1239_v8 = vshll.u32 %v1723_v11, %v1230_v9  ;;  %v1240_v26 = vshrl.u32 %v1724_v13, %v1231_v17  ;;  %v1242_v21 = vshll.u32 %v1724_v13, %v1230_v9 }
 0x158   :  { %v1086_v6 = vshll.u32 %v1085_v62, 23  ;;  %v2229_v40 = vshrl.u32 %v965_v55, 30  ;;  %v1243_v63 = vshrl.u32 %v1725_v15, %v1231_v17  ;;  %v1238_v35 = vor.u32 %v1237_v47, %v1236_v51 }
 0x159   :  { %v1241_v37 = vor.u32 %v1240_v26, %v1239_v8  ;;  %v1245_v31 = vshll.u32 %v1725_v15, %v1230_v9  ;;  %v1246_v34 = vshrl.u32 %v1726_v22, %v1231_v17  ;;  %v1119_v29 = vand.u32 8388607, %v2643_v57 }
 0x15a   :  { %v1087_v36 = vor.u32 4788187, %v1086_v6  ;;  %v967_v24 = vshll.u32 %v2229_v40, 30  ;;  %v1244_v50 = vor.u32 %v1243_v63, %v1242_v21  ;;  %v1083_v48 = vor.u32 %v1082_v14, %v1081_v4 }
 0x15b   :  { %v1232_v56 = vshrl.u32 %v1721_v5, %v1231_v17  ;;  %v1247_v62 = vor.u32 %v1246_v34, %v1245_v31  ;;  %v1116_v55 = vshrl.u32 %v1115_v19, 23  ;;  %vm1248_vm4 = vcmp.lt.s32.totalorder %v1229_v49, 1 }
 0x15c   :  { %v2239_v25 = vsub.s32 %v964_v45, %v967_v24  ;;  %vm1249_vm5 = vcmp.lt.s32.totalorder %v1229_v49, 2  ;;  %vm1251_vm6 = vcmp.lt.s32.totalorder %v1229_v49, 4  ;;  %vm1250_vm7 = vcmp.lt.s32.totalorder %v1229_v49, 3 }
 0x15d   :  { %v1253_v9 = vsel %vm1251_vm6, %v1241_v37, 2102212464  ;;  %v1256_v47 = vsel %vm1248_vm4, %v1235_v59, %v1238_v35  ;;  %v1257_v51 = vsel %vm1251_vm6, %v1244_v50, 920167782  ;;  %v1088_v8 = vand.u32 2147483647, %v1087_v36 }
 0x15e   :  { %v970_v26 = vsub.s32 0, %v2239_v25  ;;  %v1258_v6 = vsel %vm1250_vm7, %v1241_v37, %v1257_v51  ;;  %v1260_v4 = vsel %vm1248_vm4, %v1238_v35, %v1241_v37  ;;  %v1090_v14 = vcvt.s32.f32 %v1083_v48 }
 0x15f   :  { %v1259_v17 = vsel %vm1249_vm5, %v1256_v47, %v1258_v6  ;;  %v1261_v19 = vsel %vm1251_vm6, %v1247_v62, 1326507024  ;;  %v1472_v45 = vadd.s32 4294967169, %v1116_v55  ;;  %v1252_v63 = vsel %vm1248_vm4, %v1232_v56, %v1235_v59 }
 0x160   :  { %v1465_v21 = vmin.u32 %v970_v26, %v2239_v25  ;;  %v1254_v31 = vsel %vm1250_vm7, %v1238_v35, %v1253_v9  ;;  %v1262_v34 = vsel %vm1250_vm7, %v1244_v50, %v1261_v19  ;;  %v2253_v37 = vmul.f32 %v1090_v14, %v1088_v8  ;;  %v1720_v35 = vld [vmem:[%s2636_s2] ss:$0 sm:$0xff]  ;;  %s1727_s2 = smov 96  }
 0x161   :  { %v1263_v24 = vsel %vm1249_vm5, %v1260_v4, %v1262_v34  ;;  %v2249_v36 = vmul.u32.u64.low %v2213_v23, %v1259_v17  ;;  %v2250_v57 = vmul.u32.u64.high %v2213_v23, %v1259_v17, %v2249_v36  ;;  %v1122_v51 = vadd.s32 1, %v1472_v45 }
 0x162   :  { %v972_v48 = vclz %v1465_v21  ;;  %v2256_v62 = vmul.u32.u64.low %v2213_v23, %v1263_v24  ;;  %v2257_v55 = vmul.u32.u64.high %v2213_v23, %v1263_v24, %v2256_v62  ;;  %v1255_v47 = vsel %vm1249_vm5, %v1252_v63, %v1254_v31 }
 0x163   :  { %vm1123_vm8 = vcmp.gt.s32.totalorder %v1122_v51, 0  ;;  %v187_v59 = vmax.f32 %v2220_v33, 0.0  ;;  %v180_v50 = vadd.f32 %v1720_v35, %v1870_v53  ;;  %v1120_v9 = vor.u32 8388608, %v1119_v29 }
 0x164   :  { %v1466_v56 = vadd.s32 4294967294, %v972_v48  ;;  %v1124_v8 = vsel %vm1123_vm8, %v1122_v51, 0  ;;  %v181_v26 = vadd.f32 %v1720_v35, %v1891_v10  ;;  %v960_v6 = vadd.s32 %v2184_v12, %v2189_v1 }
 0x165   :  { %v1274_v49 = vadd.s32 1, %v2250_v57  ;;  %v1126_v4 = vand.u32 31, %v1124_v8  ;;  %1566 = vmatprep.mubr.msk.f32.mxu1 %vm206_vm1, %v187_v59  ;;  %v188_v33 = vmax.f32 %v180_v50, 0.0  ;;  %v1271_v14 = vmul.u32 %v2213_v23, %v1255_v47 }
 0x166   :  { %vm1467_vm11 = vcmp.lt.s32.totalorder %v1466_v56, 0  ;;  %vm1273_vm12 = vc.u32 %v2257_v55, %v2249_v36  ;;  %v189_v17 = vmax.f32 %v181_v26, 0.0  ;;  %v1092_v29 = vxor.u32 2147483648, %v2253_v37 }
 0x167   :  { %v975_v19 = vsel %vm1467_vm11, 0, %v1466_v56  ;;  %v1275_v45 = vsel %vm1273_vm12, %v1274_v49, %v2250_v57  ;;  %v1127_v21 = vsub.s32 32, %v1126_v4  ;;  %1567 = vmatmul.mubr.msk.f32.gmra.mrb[4].mxu1 %vm206_vm1, %v188_v33  ;;  %v2276_v31 = vshll.u32 %v1120_v9, 8 }
 0x168   :  { %v976_v12 = vsub.s32 32, %v975_v19  ;;  %v980_v1 = vsub.s32 4294967266, %v975_v19  ;;  %v1276_v63 = vadd.s32 %v1275_v45, %v1271_v14  ;;  %1569 = vmatprep.mubr.msk.f32.mxu1 %vm206_vm1, %v189_v17  ;;  %v1125_v23 = vshrl.u32 %v1124_v8, 5 }
 0x169   :  { %v1129_v34 = vshll.u32 %v1721_v5, %v1126_v4  ;;  %v1130_v24 = vshrl.u32 %v1722_v7, %v1127_v21  ;;  %v1133_v51 = vshrl.u32 %v1723_v11, %v1127_v21  ;;  %v977_v48 = vshll.u32 %v2239_v25, %v975_v19 }
 0x16a   :  { %v981_v57 = vadd.s32 127, %v980_v1  ;;  %v1277_v62 = vadd.s32 536870912, %v1276_v63  ;;  %v1132_v47 = vshll.u32 %v1722_v7, %v1126_v4  ;;  %v978_v59 = vshrl.u32 %v960_v6, %v976_v12 }
 0x16b   :  { %v1131_v50 = vor.u32 %v1130_v24, %v1129_v34  ;;  %v1135_v56 = vshll.u32 %v1723_v11, %v1126_v4  ;;  %v1136_v9 = vshrl.u32 %v1724_v13, %v1127_v21  ;;  %v1138_v49 = vshll.u32 %v1724_v13, %v1126_v4 }
 0x16c   :  { %v982_v26 = vshll.u32 %v981_v57, 23  ;;  %v2286_v8 = vshrl.u32 %v1277_v62, 30  ;;  %v1139_v33 = vshrl.u32 %v1725_v15, %v1127_v21  ;;  %v1134_v14 = vor.u32 %v1133_v51, %v1132_v47 }
 0x16d   :  { %v1137_v17 = vor.u32 %v1136_v9, %v1135_v56  ;;  %v1141_v25 = vshll.u32 %v1725_v15, %v1126_v4  ;;  %v1142_v19 = vshrl.u32 %v1726_v22, %v1127_v21  ;;  %v1128_v6 = vshrl.u32 %v1721_v5, %v1127_v21 }
 0x16e   :  { %v1279_v7 = vshll.u32 %v2286_v8, 30  ;;  %v1140_v11 = vor.u32 %v1139_v33, %v1138_v49  ;;  %v182_v45 = vadd.f32 %v1720_v35, %v1885_v3  ;;  %v979_v12 = vor.u32 %v978_v59, %v977_v48 }
 0x16f   :  { %v983_v1 = vor.u32 4788187, %v982_v26  ;;  %v1143_v34 = vor.u32 %v1142_v19, %v1141_v25  ;;  %vm1147_vm13 = vcmp.lt.s32.totalorder %v1125_v23, 4  ;;  %vm1144_vm14 = vcmp.lt.s32.totalorder %v1125_v23, 1 }
 0x170   :  { %v2295_v13 = vsub.s32 %v1276_v63, %v1279_v7  ;;  %vm1146_vm15 = vcmp.lt.s32.totalorder %v1125_v23, 3  ;;  %v1149_v24 = vsel %vm1147_vm13, %v1137_v17, 2102212464  ;;  %v1148_v15 = vsel %vm1144_vm14, %v1128_v6, %v1131_v50 }
 0x171   :  { %v1150_v22 = vsel %vm1146_vm15, %v1134_v14, %v1149_v24  ;;  %v1152_v4 = vsel %vm1144_vm14, %v1131_v50, %v1134_v14  ;;  %v1153_v51 = vsel %vm1147_vm13, %v1140_v11, 920167782  ;;  %vm802_vm2 = vcmp.lt.s32.totalorder %v1858_v39, 0 }
 0x172   :  { %v1282_v5 = vsub.s32 0, %v2295_v13  ;;  %vm1145_vm3 = vcmp.lt.s32.totalorder %v1125_v23, 2  ;;  %v1154_v35 = vsel %vm1146_vm15, %v1137_v17, %v1153_v51  ;;  %v1156_v21 = vsel %vm1144_vm14, %v1134_v14, %v1137_v17 }
 0x173   :  { %vm698_vm4 = vcmp.lt.s32.totalorder %v1861_v43, 0  ;;  %v984_v63 = vand.u32 2147483647, %v983_v1  ;;  %v1155_v48 = vsel %vm1145_vm3, %v1152_v4, %v1154_v35  ;;  %v1157_v57 = vsel %vm1147_vm13, %v1143_v34, 1326507024 }
 0x174   :  { %v190_v62 = vmax.f32 %v182_v45, 0.0  ;;  %vm1010_vm5 = vcmp.lt.s32.totalorder %v1870_v53, 0  ;;  %v986_v47 = vcvt.s32.f32 %v979_v12  ;;  %v1477_v59 = vmin.u32 %v1282_v5, %v2295_v13 }
 0x175   :  { %v1151_v50 = vsel %vm1145_vm3, %v1148_v15, %v1150_v22  ;;  %v1158_v56 = vsel %vm1146_vm15, %v1140_v11, %v1157_v57  ;;  %v2309_v26 = vmul.u32.u64.low %v2276_v31, %v1155_v48  ;;  %v2310_v49 = vmul.u32.u64.high %v2276_v31, %v1155_v48, %v2309_v26 }
 0x176   :  { %v1159_v9 = vsel %vm1145_vm3, %v1156_v21, %v1158_v56  ;;  %1570 = vmatmul.mubr.msk.f32.gmra.mrb[6].mxu1 %vm206_vm1, %v190_v62  ;;  %v678_v33 = vsub.s32 4, %v1965_v60  ;;  %vm906_vm6 = vcmp.lt.s32.totalorder %v1875_v58, 0  ;;  %v1284_v14 = vclz %v1477_v59 }
 0x177   :  { %v2316_v17 = vmul.u32.u64.low %v2276_v31, %v1159_v9  ;;  %v2317_v25 = vmul.u32.u64.high %v2276_v31, %v1159_v9, %v2316_v17  ;;  %vm593_vm7 = vcmp.le.f32.partialorder %v592_v28, 0.7853982  ;;  %v987_v23 = vmul.f32 %v986_v47, %v984_v63 }
 0x178   :  { %v1167_v19 = vmul.u32 %v2276_v31, %v1151_v50  ;;  %v679_v7 = vsel %vm594_vm9, %v678_v33, %v1965_v60  ;;  %v680_v6 = vsel %vm593_vm7, %v1842_v27, %v2197_v61  ;;  %v1478_v11 = vadd.s32 4294967294, %v1284_v14 }
 0x179   :  { %v681_v45 = vsel %vm593_vm7, 0, %v679_v7  ;;  %1688 = vcosq.f32 %v680_v6  ;;  %v574_v12 = vsub.s32 4, %v1996_v41  ;;  %v1170_v1 = vadd.s32 1, %v2310_v49 }
 0x17a   :  { %1690 = vsinq.f32 %v680_v6  ;;  %v685_v34 = vadd.s32 3, %v681_v45  ;;  %vm2331_vm8 = vcmp.le.f32.partialorder %v488_v32, 0.7853982  ;;  %vm1479_vm11 = vcmp.lt.s32.totalorder %v1478_v11, 0 }
 0x17b   :  { %vm1169_vm9 = vc.u32 %v2317_v25, %v2309_v26  ;;  %v575_v60 = vsel %vm490_vm10, %v574_v12, %v1996_v41  ;;  %v576_v61 = vsel %vm2331_vm8, %v1846_v30, %v2204_v16  ;;  %v885_v32 = vsel %vm802_vm2, %v884_v46, %v2145_v44 }
 0x17c   :  { %v988_v31 = vxor.u32 2147483648, %v987_v23  ;;  %v1287_v24 = vsel %vm1479_vm11, 0, %v1478_v11  ;;  %v1171_v15 = vsel %vm1169_vm9, %v1170_v1, %v2310_v49  ;;  %v781_v41 = vsel %vm698_vm4, %v780_v0, %v2180_v2 }
 0x17d   :  { %v1288_v22 = vsub.s32 32, %v1287_v24  ;;  %v1292_v4 = vsub.s32 4294967266, %v1287_v24  ;;  %v1172_v51 = vadd.s32 %v1171_v15, %v1167_v19  ;;  %v2359_v16 = vsel %vm1010_vm5, %v1092_v29, %v2253_v37 }
 0x17e   :  { %v1272_v44 = vadd.s32 %v2249_v36, %v2257_v55  ;;  %v577_v46 = vsel %vm2331_vm8, 0, %v575_v60  ;;  %1692 = vcosq.f32 %v576_v61  ;;  %v686_v2 = vand.u32 3, %v685_v34 }
 0x17f   :  { %v1293_v5 = vadd.s32 127, %v1292_v4  ;;  %v1173_v35 = vadd.s32 536870912, %v1172_v51  ;;  %1694 = vsinq.f32 %v576_v61  ;;  %v2367_v0 = vsel %vm906_vm6, %v988_v31, %v987_v23 }
 0x180   :  { %v1290_v21 = vshrl.u32 %v1272_v44, %v1288_v22  ;;  %vm2371_vm10 = vcmp.le.f32.partialorder %v800_v42, 0.7853982  ;;  %v886_v36 = vsub.s32 4, %v2041_v52  ;;  %vm684_vm12 = vweird.f32 %v1842_v27 }
 0x181   :  { %v2376_v55 = vshrl.u32 %v1173_v35, 30  ;;  %v581_v29 = vadd.s32 3, %v577_v46  ;;  %v888_v63 = vsel %vm2371_vm10, %v1858_v39, %v885_v32  ;;  %v1289_v48 = vshll.u32 %v2295_v13, %v1287_v24 }
 0x182   :  { %v1294_v57 = vshll.u32 %v1293_v5, 23  ;;  %v887_v42 = vsel %vm802_vm2, %v886_v36, %v2041_v52  ;;  %1696 = vcosq.f32 %v888_v63  ;;  %v2387_v47 = vadd.s32 %v2309_v26, %v2317_v25 }
 0x183   :  { %v1689_v62 = vpop.eup %1688  ;;  %v1175_v59 = vshll.u32 %v2376_v55, 30  ;;  %vm687_vm13 = vcmp.lt.s32.totalorder %v686_v2, 2  ;;  %vm688_vm14 = vcmp.eq.s32.totalorder %v686_v2, 0  ;;  %v1291_v56 = vor.u32 %v1290_v21, %v1289_v48 }
 0x184   :  { %v1691_v50 = vpop.eup %1690  ;;  %vm691_vm15 = vcmp.eq.s32.totalorder %v686_v2, 2  ;;  %v692_v9 = vxor.u32 2147483648, %v1689_v62  ;;  %v889_v13 = vsel %vm2371_vm10, 0, %v887_v42  ;;  %v582_v52 = vand.u32 3, %v581_v29 }
 0x185   :  { %v2392_v49 = vsub.s32 %v1172_v51, %v1175_v59  ;;  %v689_v33 = vxor.u32 2147483648, %v1691_v50  ;;  %1698 = vsinq.f32 %v888_v63  ;;  %v1295_v14 = vor.u32 4788187, %v1294_v57 }
 0x186   :  { %v693_v17 = vsel %vm691_vm15, %v692_v9, %v1691_v50  ;;  %vm2396_vm2 = vcmp.le.f32.partialorder %v696_v54, 0.7853982  ;;  %v782_v25 = vsub.s32 4, %v2110_v38  ;;  %v893_v7 = vadd.s32 3, %v889_v13 }
 0x187   :  { %v1178_v23 = vsub.s32 0, %v2392_v49  ;;  %v690_v19 = vsel %vm688_vm14, %v1689_v62, %v689_v33  ;;  %v784_v6 = vsel %vm2396_vm2, %v1861_v43, %v781_v41  ;;  %vm580_vm3 = vweird.f32 %v1846_v30 }
 0x188   :  { %v1693_v11 = vpop.eup %1692  ;;  %v694_v45 = vsel %vm687_vm13, %v690_v19, %v693_v17  ;;  %v783_v54 = vsel %vm698_vm4, %v782_v25, %v2110_v38  ;;  %1700 = vcosq.f32 %v784_v6  ;;  %v1298_v1 = vcvt.s32.f32 %v1291_v56 }
 0x189   :  { %v1695_v12 = vpop.eup %1694  ;;  %v1473_v34 = vmin.u32 %v1178_v23, %v2392_v49  ;;  %v2413_v28 = vsel %vm684_vm12, nan, %v694_v45  ;;  %v588_v60 = vxor.u32 2147483648, %v1693_v11  ;;  %v1296_v61 = vand.u32 2147483647, %v1295_v14 }
 0x18a   :  { %1330 = vrot.lane.b32.xlu0 %v2413_v28, %s1727_s2  ;;  %vm584_vm7 = vcmp.eq.s32.totalorder %v582_v52, 0  ;;  %v585_v32 = vxor.u32 2147483648, %v1695_v12  ;;  %vm587_vm8 = vcmp.eq.s32.totalorder %v582_v52, 2  ;;  %vm892_vm4 = vweird.f32 %v1858_v39 }
 0x18b   :  { %v1180_v31 = vclz %v1473_v34  ;;  %v589_v38 = vsel %vm587_vm8, %v588_v60, %v1695_v12  ;;  %v894_v24 = vand.u32 3, %v893_v7  ;;  %v785_v15 = vsel %vm2396_vm2, 0, %v783_v54 }
 0x18c   :  { %v1697_v27 = vpop.eup %1696  ;;  %vm583_vm11 = vcmp.lt.s32.totalorder %v582_v52, 2  ;;  %v586_v41 = vsel %vm584_vm7, %v1693_v11, %v585_v32  ;;  %1702 = vsinq.f32 %v784_v6  ;;  %v789_v22 = vadd.s32 3, %v785_v15 }
 0x18d   :  { %v1474_v4 = vadd.s32 4294967294, %v1180_v31  ;;  %v590_v51 = vsel %vm583_vm11, %v586_v41, %v589_v38  ;;  %v900_v44 = vxor.u32 2147483648, %v1697_v27  ;;  %vm2422_vm9 = vcmp.le.f32.partialorder %v904_v18, 0.7853982 }
 0x18e   :  { %v1299_v5 = vmul.f32 %v1298_v1, %v1296_v61  ;;  %v2428_v35 = vsel %vm580_vm3, nan, %v590_v51  ;;  %v990_v2 = vsub.s32 4, %v2229_v40  ;;  %v992_v21 = vsel %vm2422_vm9, %v1875_v58, %v2367_v0 }
 0x18f   :  { %v1699_v37 = vpop.eup %1698  ;;  %vm1475_vm10 = vcmp.lt.s32.totalorder %v1474_v4, 0  ;;  %1328 = vrot.lane.b32.xlu0 %v2428_v35, %s1727_s2  ;;  %vm895_vm12 = vcmp.lt.s32.totalorder %v894_v24, 2  ;;  %vm899_vm13 = vcmp.eq.s32.totalorder %v894_v24, 2  ;;  %1704 = vcosq.f32 %v992_v21 }
 0x190   :  { %v1183_v18 = vsel %vm1475_vm10, 0, %v1474_v4  ;;  %vm896_vm14 = vcmp.eq.s32.totalorder %v894_v24, 0  ;;  %v897_v30 = vxor.u32 2147483648, %v1699_v37  ;;  %v901_v36 = vsel %vm899_vm13, %v900_v44, %v1699_v37 }
 0x191   :  { %vm1218_vm15 = vcmp.lt.s32.totalorder %v1885_v3, 0  ;;  %v1184_v29 = vsub.s32 32, %v1183_v18  ;;  %v1188_v63 = vsub.s32 4294967266, %v1183_v18  ;;  %v790_v48 = vand.u32 3, %v789_v22 }
 0x192   :  { %v2652_v57 = vand.u32 2147483647, %v1870_v53  ;;  %v1701_v42 = vpop.eup %1700  ;;  %v1185_v62 = vshll.u32 %v2392_v49, %v1183_v18  ;;  %v898_v59 = vsel %vm896_vm14, %v1697_v27, %v897_v30  ;;  %v991_v50 = vsel %vm906_vm6, %v990_v2, %v2229_v40 }
 0x193   :  { %1706 = vsinq.f32 %v992_v21  ;;  %v1186_v56 = vshrl.u32 %v2387_v47, %v1184_v29  ;;  %v1189_v9 = vadd.s32 127, %v1188_v63  ;;  %v902_v13 = vsel %vm895_vm12, %v898_v59, %v901_v36  ;;  %v344_v36 = vld [vmem:[%s2637_s5] sm:$0xff]  ;;  %v345_v29 = vld [vmem:[%s2637_s5 + $0x8] sm:$0xff] }
 0x194   :  { %vm2440_vm2 = vcmp.le.f32.partialorder %v2652_v57, 0.7853982  ;;  %v796_v33 = vxor.u32 2147483648, %v1701_v42  ;;  %v2452_v52 = vsel %vm892_vm4, nan, %v902_v13  ;;  %v993_v14 = vsel %vm2422_vm9, 0, %v991_v50 }
 0x195   :  { %v1094_v49 = vsub.s32 4, %v2166_v20  ;;  %v1096_v40 = vsel %vm2440_vm2, %v1870_v53, %v2359_v16  ;;  %v1187_v17 = vor.u32 %v1186_v56, %v1185_v62  ;;  %v1190_v47 = vshll.u32 %v1189_v9, 23  ;;  %1334 = vrot.lane.b32.xlu1 %v2452_v52, %s1727_s2 }
 0x196   :  { %v997_v26 = vadd.s32 3, %v993_v14  ;;  %1708 = vcosq.f32 %v1096_v40  ;;  %v1703_v39 = vpop.eup %1702  ;;  %v1300_v25 = vxor.u32 2147483648, %v1299_v5  ;;  %vm795_vm6 = vcmp.eq.s32.totalorder %v790_v48, 2  ;;  %v346_v14 = vld [vmem:[%s2637_s5 + $0x10] sm:$0xff] }
 0x197   :  { %v1095_v23 = vsel %vm1010_vm5, %v1094_v49, %v2166_v20  ;;  %1710 = vsinq.f32 %v1096_v40  ;;  %vm1114_vm3 = vcmp.lt.s32.totalorder %v1891_v10, 0  ;;  %v1191_v19 = vor.u32 4788187, %v1190_v47  ;;  %v348_v49 = vld [vmem:[%s2637_s5 + $0x20] sm:$0xff] }
 0x198   :  { %v793_v7 = vxor.u32 2147483648, %v1703_v39  ;;  %v797_v16 = vsel %vm795_vm6, %v796_v33, %v1703_v39  ;;  %vm791_vm7 = vcmp.lt.s32.totalorder %v790_v48, 2  ;;  %vm792_vm8 = vcmp.eq.s32.totalorder %v790_v48, 0  ;;  %v351_v39 = vld [vmem:[%s2637_s5 + $0x38] sm:$0xff] }
 0x199   :  { %v998_v6 = vand.u32 3, %v997_v26  ;;  %v1097_v11 = vsel %vm2440_vm2, 0, %v1095_v23  ;;  %v1705_v45 = vpop.eup %1704  ;;  %v1192_v54 = vand.u32 2147483647, %v1191_v19  ;;  %v1194_v12 = vcvt.s32.f32 %v1187_v17  ;;  %v349_v17 = vld [vmem:[%s2637_s5 + $0x28] sm:$0xff]  ;;  %v350_v26 = vld [vmem:[%s2637_s5 + $0x30] sm:$0xff] }
 0x19a   :  { %v794_v1 = vsel %vm792_vm8, %v1701_v42, %v793_v7  ;;  %v1101_v34 = vadd.s32 3, %v1097_v11  ;;  %v1301_v20 = vsel %vm1218_vm15, %v1300_v25, %v1299_v5  ;;  %vm788_vm5 = vweird.f32 %v1861_v43 }
 0x19b   :  { %v798_v60 = vsel %vm791_vm7, %v794_v1, %v797_v16  ;;  %v1198_v61 = vsub.s32 4, %v2376_v55  ;;  %v1195_v32 = vmul.f32 %v1194_v12, %v1192_v54  ;;  %v1004_v38 = vxor.u32 2147483648, %v1705_v45 }
 0x19c   :  { %v2473_v31 = vsel %vm788_vm5, nan, %v798_v60  ;;  %v1102_v24 = vand.u32 3, %v1101_v34  ;;  %vm996_vm4 = vweird.f32 %v1875_v58  ;;  %vm1003_vm11 = vcmp.eq.s32.totalorder %v998_v6, 2 }
 0x19d   :  { %v1707_v15 = vpop.eup %1706  ;;  %1332 = vrot.lane.b32.xlu1 %v2473_v31, %s1727_s2  ;;  %v2655_v27 = vand.u32 2147483647, %v1885_v3  ;;  %v1302_v43 = vsub.s32 4, %v2286_v8  ;;  %v1196_v22 = vxor.u32 2147483648, %v1195_v32  ;;  %vm999_vm10 = vcmp.lt.s32.totalorder %v998_v6, 2 }
 0x19e   :  { %v1001_v4 = vxor.u32 2147483648, %v1707_v15  ;;  %v1005_v51 = vsel %vm1003_vm11, %v1004_v38, %v1707_v15  ;;  %vm1000_vm12 = vcmp.eq.s32.totalorder %v998_v6, 0  ;;  %v2658_v46 = vand.u32 2147483647, %v1891_v10 }
 0x19f   :  { %vm2480_vm9 = vcmp.le.f32.partialorder %v2655_v27, 0.7853982  ;;  %v1199_v2 = vsel %vm1114_vm3, %v1198_v61, %v2376_v55  ;;  %v1197_v37 = vsel %vm1114_vm3, %v1196_v22, %v1195_v32  ;;  %vm1104_vm14 = vcmp.eq.s32.totalorder %v1102_v24, 0 }
 0x1a0   :  { %v1304_v44 = vsel %vm2480_vm9, %v1885_v3, %v1301_v20  ;;  %vm2490_vm13 = vcmp.le.f32.partialorder %v2658_v46, 0.7853982  ;;  %v1709_v21 = vpop.eup %1708  ;;  %v1002_v18 = vsel %vm1000_vm12, %v1705_v45, %v1001_v4  ;;  %v1303_v30 = vsel %vm1218_vm15, %v1302_v43, %v2286_v8 }
 0x1a1   :  { %v1711_v63 = vpop.eup %1710  ;;  %v1006_v55 = vsel %vm999_vm10, %v1002_v18, %v1005_v51  ;;  %v1108_v48 = vxor.u32 2147483648, %v1709_v21  ;;  %v1200_v57 = vsel %vm2490_vm13, %v1891_v10, %v1197_v37  ;;  %1712 = vcosq.f32 %v1304_v44 }
 0x1a2   :  { %v2513_v0 = vsel %vm996_vm4, nan, %v1006_v55  ;;  %v1105_v8 = vxor.u32 2147483648, %v1711_v63  ;;  %vm1107_vm15 = vcmp.eq.s32.totalorder %v1102_v24, 2  ;;  %1714 = vcosq.f32 %v1200_v57 }
 0x1a3   :  { %1336 = vrot.lane.b32.xlu0 %v2513_v0, %s1727_s2  ;;  %v1109_v42 = vsel %vm1107_vm15, %v1108_v48, %v1711_v63  ;;  %v1201_v62 = vsel %vm2490_vm13, 0, %v1199_v2  ;;  %1716 = vsinq.f32 %v1200_v57  ;;  %v1624_v59 = vpack.c.bf16 %v345_v29, %v344_v36 }
 0x1a4   :  { %vm1103_vm2 = vcmp.lt.s32.totalorder %v1102_v24, 2  ;;  %v1106_v50 = vsel %vm1104_vm14, %v1709_v21, %v1105_v8  ;;  %v1305_v58 = vsel %vm2480_vm9, 0, %v1303_v30  ;;  %vm1100_vm6 = vweird.f32 %v1870_v53  ;;  %v347_v53 = vld [vmem:[%s2637_s5 + $0x18] sm:$0xff] }
 0x1a5   :  { %v1110_v56 = vsel %vm1103_vm2, %v1106_v50, %v1109_v42  ;;  %1718 = vsinq.f32 %v1304_v44  ;;  %1625 = vmatprep.subr.bf16.mxu0 %v1624_v59  ;;  %1640 = vmatprep.subr.bf16.mxu1 %v1624_v59  ;;  %v1205_v13 = vadd.s32 3, %v1201_v62  ;;  %v1309_v33 = vadd.s32 3, %v1305_v58 }
 0x1a6   :  { %v2523_v9 = vsel %vm1100_vm6, nan, %v1110_v56  ;;  %1627 = vmatpush3.bf16.msra.mxu0 %v1624_v59  ;;  %1644 = vmatpush3.bf16.msra.mxu1 %v1624_v59  ;;  %v1628_v40 = vpack.c.bf16 %v347_v53, %v346_v14  ;;  %v1632_v47 = vpack.c.bf16 %v349_v17, %v348_v49  ;;  %v1636_v6 = vpack.c.bf16 %v351_v39, %v350_v26  ;;  %v1439_v59 = vld [vmem:[%s2639_s6] ss:$0 sm:$0xff] }
 0x1a7   :  { %1338 = vrot.lane.b32.xlu1 %v2523_v9, %s1727_s2  ;;  %v1206_v25 = vand.u32 3, %v1205_v13  ;;  %v1310_v19 = vand.u32 3, %v1309_v33  ;;  %vm1204_vm4 = vweird.f32 %v1891_v10  ;;  %vm1308_vm10 = vweird.f32 %v1885_v3  ;;  %v1430_v10 = vld [vmem:[%s2638_s4] ss:$0 sm:$0xff] }
 0x1a8   :  { %1629 = vmatprep.subr.bf16.mxu0 %v1628_v40  ;;  %1641 = vmatprep.subr.bf16.mxu1 %v1628_v40  ;;  %vm1400_vm12 = vcmask 785408  }
 0x1a9   :  { %vm1211_vm3 = vcmp.eq.s32.totalorder %v1206_v25, 2  ;;  %vm1208_vm7 = vcmp.eq.s32.totalorder %v1206_v25, 0  ;;  %vm1315_vm8 = vcmp.eq.s32.totalorder %v1310_v19, 2  ;;  %vm1207_vm5 = vcmp.lt.s32.totalorder %v1206_v25, 2 }
 0x1aa   :  { %1631 = vmatpush3.bf16.msra.mxu0 %v1628_v40  ;;  %1645 = vmatpush3.bf16.msra.mxu1 %v1628_v40  ;;  %vm1312_vm11 = vcmp.eq.s32.totalorder %v1310_v19, 0  ;;  %vm1311_vm9 = vcmp.lt.s32.totalorder %v1310_v19, 2 }
 0x1ab   :  { %v1713_v23 = vpop.eup %1712  ;;  %1633 = vmatprep.subr.bf16.mxu0 %v1632_v47  ;;  %1642 = vmatprep.subr.bf16.mxu1 %v1632_v47 }
 0x1ac   :  { %v1715_v7 = vpop.eup %1714  ;;  %v1316_v16 = vxor.u32 2147483648, %v1713_v23 }
 0x1ad   :  { %v1717_v11 = vpop.eup %1716  ;;  %v1212_v45 = vxor.u32 2147483648, %v1715_v7 }
 0x1ae   :  { %v1209_v54 = vxor.u32 2147483648, %v1717_v11  ;;  %1635 = vmatpush3.bf16.msra.mxu0 %v1632_v47  ;;  %1646 = vmatpush3.bf16.msra.mxu1 %v1632_v47 }
 0x1af   :  { %v1719_v12 = vpop.eup %1718  ;;  %v1213_v1 = vsel %vm1211_vm3, %v1212_v45, %v1717_v11  ;;  %1637 = vmatprep.subr.bf16.mxu0 %v1636_v6  ;;  %1643 = vmatprep.subr.bf16.mxu1 %v1636_v6 }
 0x1b0   :  { %v1210_v34 = vsel %vm1208_vm7, %v1715_v7, %v1209_v54  ;;  %v1313_v20 = vxor.u32 2147483648, %v1719_v12  ;;  %v1317_v60 = vsel %vm1315_vm8, %v1316_v16, %v1719_v12 }
 0x1b1   :  { %v1214_v61 = vsel %vm1207_vm5, %v1210_v34, %v1213_v1 }
 0x1b2   :  { %v2546_v32 = vsel %vm1204_vm4, nan, %v1214_v61  ;;  %v1314_v38 = vsel %vm1312_vm11, %v1713_v23, %v1313_v20  ;;  %1639 = vmatpush3.bf16.msra.mxu0 %v1636_v6  ;;  %1647 = vmatpush3.bf16.msra.mxu1 %v1636_v6 }
 0x1b3   :  { %1340 = vrot.lane.b32.xlu0 %v2546_v32, %s1727_s2  ;;  %v1318_v24 = vsel %vm1311_vm9, %v1314_v38, %v1317_v60 }
 0x1b4   :  { %v2551_v15 = vsel %vm1308_vm10, nan, %v1318_v24 }
 0x1b5   :  { %1342 = vrot.lane.b32.xlu1 %v2551_v15, %s1727_s2 }
 0x1b9   :  { %v1562_v27 = vpop.f32.mrb[0].mxu1 }
 0x1ba   :  { %v303_v41 = vadd.f32 %v1562_v27, %v1430_v10  ;;  %v297_v43 = vpop.f32.mrb[1].mxu1 }
 0x1bb   :  { %v298_v22 = vadd.f32 %v1430_v10, %v297_v43 }
 0x1bc   :  { %v337_v51 = vmax.f32 %v303_v41, 0.0 }
 0x1bd   :  { %v336_v4 = vmax.f32 %v298_v22, 0.0 }
 0x1bf   :  { %1588 = vmatprep.mubr.msk.f32.mxu0 %vm206_vm1, %v336_v4 }
 0x1c0   :  { %1589 = vmatmul.mubr.msk.f32.vlgmr.msra.gmra.mrb[8].mxu0 %vm206_vm1, %v337_v51 }
 0x1fc   :  { %v1331_v17 = vpop.permute.xlu0 %1330 }
 0x201   :  { %v1329_v26 = vpop.permute.xlu0 %1328 }
 0x207   :  { %v1335_v40 = vpop.permute.xlu1 %1334 }
 0x20f   :  { %v1333_v47 = vpop.permute.xlu1 %1332 }
 0x212   :  { %v1565_v3 = vpop.f32.mrb[2].mxu1 }
 0x213   :  { %v313_v44 = vadd.f32 %v1565_v3, %v1430_v10  ;;  %v307_v46 = vpop.f32.mrb[3].mxu1 }
 0x214   :  { %v308_v5 = vadd.f32 %v1430_v10, %v307_v46 }
 0x215   :  { %v339_v21 = vmax.f32 %v313_v44, 0.0  ;;  %v1337_v25 = vpop.permute.xlu0 %1336 }
 0x216   :  { %v338_v2 = vmax.f32 %v308_v5, 0.0 }
 0x218   :  { %1591 = vmatprep.mubr.msk.f32.mxu0 %vm206_vm1, %v338_v2 }
 0x219   :  { %1592 = vmatmul.mubr.msk.f32.gmra.mrb[10].mxu0 %vm206_vm1, %v339_v21  ;;  %v1339_v39 = vpop.permute.xlu1 %1338 }
 0x225   :  { %v1341_v19 = vpop.permute.xlu0 %1340 }
 0x227   :  { %v1343_v23 = vpop.permute.xlu1 %1342 }
 0x23a   :  { %v1568_v37 = vpop.f32.mrb[4].mxu1 }
 0x23b   :  { %v323_v18 = vadd.f32 %v1568_v37, %v1430_v10  ;;  %v317_v30 = vpop.f32.mrb[5].mxu1 }
 0x23c   :  { %v318_v36 = vadd.f32 %v1430_v10, %v317_v30 }
 0x23d   :  { %v341_v63 = vmax.f32 %v323_v18, 0.0 }
 0x23e   :  { %v340_v29 = vmax.f32 %v318_v36, 0.0 }
 0x240   :  { %1594 = vmatprep.mubr.msk.f32.mxu0 %vm206_vm1, %v340_v29 }
 0x241   :  { %1595 = vmatmul.mubr.msk.f32.gmra.mrb[12].mxu0 %vm206_vm1, %v341_v63 }
 0x249   :  { %v1571_v55 = vpop.f32.mrb[6].mxu1 }
 0x24a   :  { %v333_v48 = vadd.f32 %v1571_v55, %v1430_v10  ;;  %v327_v57 = vpop.f32.mrb[7].mxu1 }
 0x24b   :  { %v328_v8 = vadd.f32 %v1430_v10, %v327_v57 }
 0x24c   :  { %v343_v62 = vmax.f32 %v333_v48, 0.0 }
 0x24d   :  { %v342_v42 = vmax.f32 %v328_v8, 0.0 }
 0x24f   :  { %1597 = vmatprep.mubr.msk.f32.mxu1 %vm206_vm1, %v342_v42 }
 0x250   :  { %1598 = vmatmul.mubr.msk.f32.vlgmr.msra.gmra.mrb[8].mxu1 %vm206_vm1, %v343_v62 }
 0x293   :  { %v1590_v50 = vpop.f32.mrb[8].mxu0 }
 0x294   :  { %v455_v58 = vadd.f32 %v1590_v50, %v1439_v59  ;;  %v449_v56 = vpop.f32.mrb[9].mxu0 }
 0x295   :  { %v450_v13 = vadd.f32 %v1439_v59, %v449_v56 }
 0x296   :  { %1362 = vrot.lane.b32.xlu1 %v455_v58, %s1728_s13  ;;  %v1385_v16 = vsel %vm38_vm0, %v455_v58, %v1331_v17 }
 0x297   :  { %1360 = vrot.lane.b32.xlu0 %v450_v13, %s1728_s13  ;;  %v1384_v45 = vsel %vm38_vm0, %v450_v13, %v1329_v26 }
 0x2ec   :  { %v1593_v33 = vpop.f32.mrb[10].mxu0 }
 0x2ed   :  { %v465_v14 = vadd.f32 %v1593_v33, %v1439_v59  ;;  %v459_v53 = vpop.f32.mrb[11].mxu0 }
 0x2ee   :  { %v460_v49 = vadd.f32 %v1439_v59, %v459_v53 }
 0x2ef   :  { %1366 = vrot.lane.b32.xlu1 %v465_v14, %s1728_s13  ;;  %v1387_v43 = vsel %vm38_vm0, %v465_v14, %v1335_v40 }
 0x2f0   :  { %1364 = vrot.lane.b32.xlu0 %v460_v49, %s1728_s13  ;;  %v1386_v4 = vsel %vm38_vm0, %v460_v49, %v1333_v47 }
 0x308   :  { %v1363_v7 = vpop.permute.xlu1 %1362 }
 0x309   :  { %v1393_v6 = vsel %vm206_vm1, %v1385_v16, %v1363_v7  ;;  %v1361_v11 = vpop.permute.xlu0 %1360 }
 0x30a   :  { %v1402_v54 = vsel %vm1400_vm12, %v1393_v6, %v2413_v28  ;;  %v1392_v12 = vsel %vm206_vm1, %v1384_v45, %v1361_v11 }
 0x30b   :  { %1410 = vst [vmem:[%s2640_s7 + $0x8] sm:$0xff] %v1402_v54  ;;  %v1401_v1 = vsel %vm1400_vm12, %v1392_v12, %v2428_v35 }
 0x30c   :  { %1409 = vst [vmem:[%s2640_s7] sm:$0xff] %v1401_v1 }
 0x314   :  { %v1596_v34 = vpop.f32.mrb[12].mxu0 }
 0x315   :  { %v475_v20 = vadd.f32 %v1596_v34, %v1439_v59  ;;  %v469_v60 = vpop.f32.mrb[13].mxu0 }
 0x316   :  { %v470_v61 = vadd.f32 %v1439_v59, %v469_v60 }
 0x317   :  { %1370 = vrot.lane.b32.xlu1 %v475_v20, %s1728_s13  ;;  %v1389_v2 = vsel %vm38_vm0, %v475_v20, %v1339_v39 }
 0x318   :  { %1368 = vrot.lane.b32.xlu0 %v470_v61, %s1728_s13 }
 0x323   :  { %v1599_v28 = vpop.f32.mrb[8].mxu1 }
 0x324   :  { %v485_v38 = vadd.f32 %v1599_v28, %v1439_v59  ;;  %v479_v24 = vpop.f32.mrb[9].mxu1 }
 0x325   :  { %v480_v10 = vadd.f32 %v1439_v59, %v479_v24 }
 0x326   :  { %1374 = vrot.lane.b32.xlu1 %v485_v38, %s1728_s13  ;;  %v1391_v35 = vsel %vm38_vm0, %v485_v38, %v1343_v23 }
 0x327   :  { %1372 = vrot.lane.b32.xlu0 %v480_v10, %s1728_s13  ;;  %v1390_v27 = vsel %vm38_vm0, %v480_v10, %v1341_v19 }
 0x361   :  { %v1367_v41 = vpop.permute.xlu1 %1366 }
 0x362   :  { %v1395_v22 = vsel %vm206_vm1, %v1387_v43, %v1367_v41  ;;  %v1365_v51 = vpop.permute.xlu0 %1364 }
 0x363   :  { %v1404_v3 = vsel %vm1400_vm12, %v1395_v22, %v2452_v52  ;;  %v1394_v44 = vsel %vm206_vm1, %v1386_v4, %v1365_v51  ;;  %v1388_v52 = vsel %vm38_vm0, %v470_v61, %v1337_v25 }
 0x364   :  { %1412 = vst [vmem:[%s2640_s7 + $0x18] sm:$0xff] %v1404_v3  ;;  %v1403_v46 = vsel %vm1400_vm12, %v1394_v44, %v2473_v31 }
 0x365   :  { %1411 = vst [vmem:[%s2640_s7 + $0x10] sm:$0xff] %v1403_v46 }
 0x389   :  { %v1371_v5 = vpop.permute.xlu1 %1370 }
 0x38a   :  { %v1397_v21 = vsel %vm206_vm1, %v1389_v2, %v1371_v5  ;;  %v1369_v37 = vpop.permute.xlu0 %1368 }
 0x38b   :  { %v1406_v18 = vsel %vm1400_vm12, %v1397_v21, %v2523_v9  ;;  %v1396_v30 = vsel %vm206_vm1, %v1388_v52, %v1369_v37 }
 0x38c   :  { %1414 = vst [vmem:[%s2640_s7 + $0x28] sm:$0xff] %v1406_v18  ;;  %v1405_v31 = vsel %vm1400_vm12, %v1396_v30, %v2513_v0 }
 0x38d   :  { %1413 = vst [vmem:[%s2640_s7 + $0x20] sm:$0xff] %v1405_v31 }
 0x398   :  { %v1375_v36 = vpop.permute.xlu1 %1374 }
 0x399   :  { %v1399_v29 = vsel %vm206_vm1, %v1391_v35, %v1375_v36  ;;  %v1373_v63 = vpop.permute.xlu0 %1372 }
 0x39a   :  { %v1408_v9 = vsel %vm1400_vm12, %v1399_v29, %v2551_v15  ;;  %v1398_v55 = vsel %vm206_vm1, %v1390_v27, %v1373_v63 }
 0x39b   :  { %1416 = vst [vmem:[%s2640_s7 + $0x38] sm:$0xff] %v1408_v9  ;;  %v1407_v0 = vsel %vm1400_vm12, %v1398_v55, %v2546_v32 }
 0x39c   :  { %1415 = vst [vmem:[%s2640_s7 + $0x30] sm:$0xff] %v1407_v0 }

</bundles_post_ra>
